<compile_context>
chip_gen: v7x
topology: tpu7x:2x2x1
jax: 0.10.0
libtpu: 0.0.40
codegen_flags: <defaults>
</compile_context>

<pallas_src>
import math
import jax
import jax.numpy as jnp
from jax.experimental import pallas as pl
from jax.experimental.pallas import tpu as pltpu

# Scoped-VMEM budget: safe on every generation (v5e/v6e: 128 MiB physical,
# v7x: 64 MiB physical -> keep <= ~48-56 MiB of scoped VMEM).
_VMEM_LIMIT = 48 * 1024 * 1024


def _round_up(x, m):
    return ((x + m - 1) // m) * m


def _ln(x, g, b, eps=1e-5):
    mean = jnp.mean(x, axis=-1, keepdims=True)
    var = jnp.mean(jnp.square(x - mean), axis=-1, keepdims=True)
    return (x - mean) * jax.lax.rsqrt(var + eps) * g + b


def _const_spec(shape):
    # Same block every grid step -> stays VMEM-resident (weights / LN params / biases).
    return pl.BlockSpec(shape, lambda i, _n=len(shape): (0,) * _n)


def _row_spec(tile_m, cols):
    # Row-tiled activation block.
    return pl.BlockSpec((tile_m, cols), lambda i: (i, 0))


# ----------------------------- fused Pallas kernels --------------------------

def make_patch_embed_call(M_pad, TILE_M, Cp, H):
    """(M_pad, Cp) patches @ W  +  (cls/pos/bias) table -> (M_pad, H), dense stores."""

    def kernel(p_ref, w_ref, t_ref, o_ref):
        o_ref[...] = (jnp.dot(p_ref[...], w_ref[...],
                              preferred_element_type=jnp.float32) + t_ref[...])

    return pl.pallas_call(
        kernel,
        out_shape=jax.ShapeDtypeStruct((M_pad, H), jnp.float32),
        grid=(M_pad // TILE_M,),
        in_specs=[_row_spec(TILE_M, Cp),
                  _const_spec((Cp, H)),
                  _row_spec(TILE_M, H)],
        out_specs=_row_spec(TILE_M, H),
        compiler_params=pltpu.CompilerParams(
            dimension_semantics=("parallel",), vmem_limit_bytes=_VMEM_LIMIT),
    )


def make_block_call(M_pad, TILE_M, H, nhKL, hidden):
    """One transformer block, fully fused, tiled over rows:
    LN -> Qproj -> block-diagonal inducing-point attention -> out-proj -> residual
    -> LN -> GELU MLP -> residual.  One HBM read + one HBM write of the activation
    per layer; weights are bf16 and VMEM-resident across the row tiles."""

    def kernel(x_ref, ling_ref, linb_ref, lng_ref, lnb_ref,
               wq_ref, bq_ref, kbd_ref, ones_ref, vbd_ref, wo_ref, bo_ref,
               w1_ref, b1_ref, w2_ref, b2_ref, o_ref):
        x = x_ref[...]                                           # (TILE_M, H) f32
        # ---- attention ----
        x_ln = _ln(x, ling_ref[...], linb_ref[...]).astype(jnp.bfloat16)
        q = jnp.dot(x_ln, wq_ref[...],
                    preferred_element_type=jnp.float32) + bq_ref[...]
        # One full-width score matmul against the block-diagonal inducing keys
        # (per-head 1/sqrt(dh) scale folded into kbd at init).
        s = jnp.dot(q.astype(jnp.bfloat16), kbd_ref[...],
                    preferred_element_type=jnp.float32)          # (TILE_M, nh*KL)
        # A row-global max is constant across every head's segment, so it is a valid
        # shift for each per-head softmax (single lane reduction, no reshapes).
        s = s - jnp.max(s, axis=-1, keepdims=True)
        p = jnp.exp(s)
        # Per-head denominators via a block-diagonal ones matmul: the MXU does the
        # segment sum, avoiding (M, nh, KL) relayouts and sub-128-lane slices.
        denom = jnp.dot(p.astype(jnp.bfloat16), ones_ref[...],
                        preferred_element_type=jnp.float32)
        attn = (p * pl.reciprocal(denom + 1e-20, approx=True)).astype(jnp.bfloat16)
        ctx = jnp.dot(attn, vbd_ref[...],
                      preferred_element_type=jnp.float32)        # (TILE_M, H)
        attn_out = jnp.dot(ctx.astype(jnp.bfloat16), wo_ref[...],
                           preferred_element_type=jnp.float32) + bo_ref[...]
        z_prime = x + attn_out                                    # residual 1
        # ---- MLP ----
        z_ln = _ln(z_prime, lng_ref[...], lnb_ref[...]).astype(jnp.bfloat16)
        h1 = jnp.dot(z_ln, w1_ref[...],
                     preferred_element_type=jnp.float32) + b1_ref[...]
        # TODO(synk): exact FC definition unknown; tanh-approx GELU MLP used.
        h1 = jax.nn.gelu(h1, approximate=True).astype(jnp.bfloat16)
        mlp = jnp.dot(h1, w2_ref[...],
                      preferred_element_type=jnp.float32) + b2_ref[...]
        o_ref[...] = mlp + z_prime                                # residual 2

    in_specs = [
        _row_spec(TILE_M, H),                                     # x (residual stream)
        _const_spec((1, H)), _const_spec((1, H)),                 # input-LN gamma/beta
        _const_spec((1, H)), _const_spec((1, H)),                 # MLP-LN gamma/beta
        _const_spec((H, H)), _const_spec((1, H)),                 # wq, bq
        _const_spec((H, nhKL)),                                   # block-diag K (scaled)
        _const_spec((nhKL, nhKL)),                                # block-diag ones
        _const_spec((nhKL, H)),                                   # block-diag V
        _const_spec((H, H)), _const_spec((1, H)),                 # wo, bo
        _const_spec((H, hidden)), _const_spec((1, hidden)),       # w1, b1
        _const_spec((hidden, H)), _const_spec((1, H)),            # w2, b2
    ]
    return pl.pallas_call(
        kernel,
        out_shape=jax.ShapeDtypeStruct((M_pad, H), jnp.float32),
        grid=(M_pad // TILE_M,),
        in_specs=in_specs,
        out_specs=_row_spec(TILE_M, H),
        compiler_params=pltpu.CompilerParams(
            dimension_semantics=("parallel",), vmem_limit_bytes=_VMEM_LIMIT),
    )


def make_head_call(B, H, NCP):
    def kernel(x_ref, g_ref, b_ref, w_ref, bias_ref, o_ref):
        x = _ln(x_ref[...], g_ref[...], b_ref[...]).astype(jnp.bfloat16)
        o_ref[...] = jnp.dot(x, w_ref[...],
                             preferred_element_type=jnp.float32) + bias_ref[...]

    return pl.pallas_call(
        kernel,
        out_shape=jax.ShapeDtypeStruct((B, NCP), jnp.float32),
        grid=(1,),
        in_specs=[_const_spec((B, H)),
                  _const_spec((1, H)), _const_spec((1, H)),
                  _const_spec((H, NCP)), _const_spec((1, NCP))],
        out_specs=_const_spec((B, NCP)),
        compiler_params=pltpu.CompilerParams(
            dimension_semantics=("arbitrary",), vmem_limit_bytes=_VMEM_LIMIT),
    )


# ------------------------------- forward -------------------------------------

def vit_forward(params, X, cfg):
    B, C, Hi, Wi = X.shape
    ps, H, L = cfg["patch_size"], cfg["hdim"], cfg["max_len"]
    nh = cfg["num_heads"]
    KL = cfg["keys_len"]
    S, depth, nc = cfg["sample_size"], cfg["depth"], cfg["num_class"]
    hidden = 4 * H
    nhp, nwp = Hi // ps, Wi // ps
    num_patches = nhp * nwp
    Cp = C * ps * ps
    M = B * L
    TILE_M = 256 if M >= 256 else _round_up(M, 16)   # 16-sublane aligned (bf16 tiles)
    M_pad = _round_up(M, TILE_M)
    nhKL = nh * KL
    NCP = max(128, _round_up(nc, 128))

    pp = params["patch"]
    # Conv2d(stride=patch) == patchify + matmul; patchify is a one-time tiny relayout.
    patches = (X.reshape(B, C, nhp, ps, nwp, ps)
                .transpose(0, 2, 4, 1, 3, 5)
                .reshape(B, num_patches, Cp))
    # Position-major row layout (row = pos*B + b), position 0 = CLS (zero patch row):
    # the final CLS gather becomes a contiguous front slice instead of a strided gather.
    patches_pm = jnp.concatenate(
        [jnp.zeros((1, B, Cp), patches.dtype), jnp.swapaxes(patches, 0, 1)], axis=0)
    patches_flat = jnp.pad(patches_pm.reshape(M, Cp),
                           ((0, M_pad - M), (0, 0))).astype(jnp.bfloat16)

    # cls-token + positional-embedding + conv-bias additive table built once host-side,
    # so the patch-embed kernel is one dense matmul + add + dense store.
    table = pp["pos"] + pp["conv_b"][None, :]                    # (L, H): pos + bias
    table = table.at[0].set(pp["cls"] + pp["pos"][0])            # CLS row (no conv bias)
    table = jnp.pad(jnp.repeat(table, B, axis=0), ((0, M_pad - M), (0, 0)))

    z = make_patch_embed_call(M_pad, TILE_M, Cp, H)(
        patches_flat, pp["w"], table)                            # (M_pad, H) f32

    block_call = make_block_call(M_pad, TILE_M, H, nhKL, hidden)
    ln_g = params["ln_g"][None, :]
    ln_b = params["ln_b"][None, :]
    ones_bd = params["ones_bd"]

    # TODO(synk): SCGP sampling noise / KL not reconstructable from the reference file;
    # deterministic posterior mean is used and kl = 0.
    total_kl = 0.0
    for i in range(depth):
        # Layer 0 normalizes its input with the patch-embedding LayerNorm params,
        # later layers with the shared LayerNorm (matches the reference forward).
        if i == 0:
            lin_g, lin_b = pp["ln_g"][None, :], pp["ln_b"][None, :]
        else:
            lin_g, lin_b = ln_g, ln_b
        sp, fp = params["scgp"][i], params["fc"][i]
        z = block_call(z, lin_g, lin_b, ln_g, ln_b,
                       sp["wq"], sp["bq"][None, :],
                       sp["kbd"], ones_bd, sp["vbd"],
                       sp["wo"], sp["bo"][None, :],
                       fp["w1"], fp["b1"][None, :],
                       fp["w2"], fp["b2"][None, :])

    # TODO(synk): the reference also computes cur_k = FC/LN(self.keys[i]) each layer but
    # never feeds it into anything downstream; that dead chain is dropped (no effect).

    cls = z[:B, :]                                               # contiguous CLS rows
    hp = params["head"]
    logits_pad = make_head_call(B, H, NCP)(
        cls, hp["ln_g"][None, :], hp["ln_b"][None, :],
        hp["w_pad"], hp["b_pad"][None, :])
    logits = logits_pad[:, :nc]
    # All S posterior "samples" are identical under the deterministic approximation:
    # replicate at the output (b-major / s-minor row order like the reference reshape).
    logits = jnp.repeat(logits, S, axis=0)                       # (B*S, num_class)
    return logits, total_kl


# ------------------------------- parameters ----------------------------------

def _block_diag(blocks):
    """(nh, r, c) -> (nh*r, nh*c) block-diagonal."""
    nh, r, c = blocks.shape
    out = jnp.zeros((nh * r, nh * c), blocks.dtype)
    for h in range(nh):
        out = out.at[h * r:(h + 1) * r, h * c:(h + 1) * c].set(blocks[h])
    return out


def init_params(key, cfg):
    H, C, ps = cfg["hdim"], cfg["in_channels"], cfg["patch_size"]
    nh, KL = cfg["num_heads"], cfg["keys_len"]
    dh = H // nh
    depth, L, nc = cfg["depth"], cfg["max_len"], cfg["num_class"]
    hidden = 4 * H
    Cp = C * ps * ps
    NCP = max(128, _round_up(nc, 128))
    scale = 1.0 / math.sqrt(dh)

    keys_iter = iter(jax.random.split(key, 128))

    def nrm(shape, s=0.02):
        return (s * jax.random.normal(next(keys_iter), shape)).astype(jnp.float32)

    def bf16(x):
        return x.astype(jnp.bfloat16)

    conv_w = nrm((H, C, ps, ps))
    head_w = nrm((H, nc))

    params = {
        "ln_g": jnp.ones((H,), jnp.float32),
        "ln_b": jnp.zeros((H,), jnp.float32),
        # Block-diagonal (KLxKL) ones blocks: per-head softmax denominators come from
        # one full-width MXU matmul instead of per-head lane slices / reshapes.
        "ones_bd": bf16(_block_diag(jnp.ones((nh, KL, KL), jnp.float32))),
        "patch": {
            # conv kernel pre-flattened to a (Cp, H) bf16 matmul weight at init
            "w": bf16(conv_w.reshape(H, Cp).T),
            "conv_b": jnp.zeros((H,), jnp.float32),
            "cls": nrm((H,)),
            "pos": nrm((L, H)),
            "ln_g": jnp.ones((H,), jnp.float32),
            "ln_b": jnp.zeros((H,), jnp.float32),
        },
        "scgp": [],
        "fc": [],
        "head": {
            "ln_g": jnp.ones((H,), jnp.float32),
            "ln_b": jnp.zeros((H,), jnp.float32),
            # Lane-dense classifier: zero-padded to 128 output lanes once at init.
            "w_pad": bf16(jnp.pad(head_w, ((0, 0), (0, NCP - nc)))),
            "b_pad": jnp.zeros((NCP,), jnp.float32),
        },
    }
    for _ in range(depth):
        ind_k = nrm((nh, KL, dh), s=1.0)
        ind_v = nrm((nh, KL, dh), s=1.0)
        params["scgp"].append({
            "wq": bf16(nrm((H, H))),
            "bq": jnp.zeros((H,), jnp.float32),
            # Inducing keys pre-packed block-diagonally (1/sqrt(dh) scale folded in):
            # scores are one (M,H)@(H,nh*KL) matmul.
            "kbd": bf16(_block_diag(jnp.swapaxes(ind_k, 1, 2) * scale)),
            # Inducing values pre-packed block-diagonally: context is one
            # (M,nh*KL)@(nh*KL,H) matmul, per-head outputs land in their lane slots.
            "vbd": bf16(_block_diag(ind_v)),
            "wo": bf16(nrm((H, H))),
            "bo": jnp.zeros((H,), jnp.float32),
        })
        params["fc"].append({
            "w1": bf16(nrm((H, hidden))),
            "b1": jnp.zeros((hidden,), jnp.float32),
            "w2": bf16(nrm((hidden, H))),
            "b2": jnp.zeros((H,), jnp.float32),
        })
    return params


# --------------------------------- main ---------------------------------------

if __name__ == "__main__":
    cfg = dict(depth=2, patch_size=4, in_channels=3, max_len=17, num_class=10,
               hdim=32, num_heads=4, sample_size=2, keys_len=8)
    key = jax.random.PRNGKey(0)
    pkey, xkey = jax.random.split(key)
    params = init_params(pkey, cfg)

    # X: (batch=2, channels=3, 16, 16), NCHW like PyTorch.
    X = jax.random.normal(xkey, (2, cfg["in_channels"], 16, 16), dtype=jnp.float32)

    fwd = jax.jit(lambda p, x: vit_forward(p, x, cfg))
    logits, total_kl = fwd(params, X)
    logits = jax.block_until_ready(logits)
    assert logits.shape == (2 * cfg["sample_size"], cfg["num_class"]), logits.shape
    assert bool(jnp.all(jnp.isfinite(logits)))
    print("KERNEL_OK")
</pallas_src>

<mosaic_0001>
module attributes {stable_mosaic.version = 11 : i64} {
  func.func @kernel(%arg0: i32, %arg1: memref<2x32xf32, #tpu.memory_space<vmem>>, %arg2: memref<1x32xf32, #tpu.memory_space<vmem>>, %arg3: memref<1x32xf32, #tpu.memory_space<vmem>>, %arg4: memref<32x128xbf16, #tpu.memory_space<vmem>>, %arg5: memref<1x128xf32, #tpu.memory_space<vmem>>, %arg6: memref<2x128xf32, #tpu.memory_space<vmem>>) attributes {dimension_semantics = [#tpu.dimension_semantics<arbitrary>], iteration_bounds = array<i64: 1>, scalar_prefetch = 0 : i64, scratch_operands = 0 : i64, tpu.core_type = #tpu.core_type<tc>, window_params = [{pipeline_mode = #tpu.pipeline_mode<synchronous>, transform_indices = @transform_0, window_bounds = array<i64: 2, 32>}, {pipeline_mode = #tpu.pipeline_mode<synchronous>, transform_indices = @transform_1, window_bounds = array<i64: 1, 32>}, {pipeline_mode = #tpu.pipeline_mode<synchronous>, transform_indices = @transform_2, window_bounds = array<i64: 1, 32>}, {pipeline_mode = #tpu.pipeline_mode<synchronous>, transform_indices = @transform_3, window_bounds = array<i64: 32, 128>}, {pipeline_mode = #tpu.pipeline_mode<synchronous>, transform_indices = @transform_4, window_bounds = array<i64: 1, 128>}, {pipeline_mode = #tpu.pipeline_mode<synchronous>, transform_indices = @transform_5, window_bounds = array<i64: 2, 128>}]} {
    %c0 = arith.constant 0 : index
    %c0_0 = arith.constant 0 : index
    %0 = vector.load %arg1[%c0, %c0_0] : memref<2x32xf32, #tpu.memory_space<vmem>>, vector<2x32xf32>
    %c0_1 = arith.constant 0 : index
    %c0_2 = arith.constant 0 : index
    %1 = vector.load %arg2[%c0_1, %c0_2] : memref<1x32xf32, #tpu.memory_space<vmem>>, vector<1x32xf32>
    %c0_3 = arith.constant 0 : index
    %c0_4 = arith.constant 0 : index
    %2 = vector.load %arg3[%c0_3, %c0_4] : memref<1x32xf32, #tpu.memory_space<vmem>>, vector<1x32xf32>
    %cst = arith.constant dense<0.000000e+00> : vector<2xf32>
    %3 = vector.multi_reduction <add>, %0, %cst [1] : vector<2x32xf32> to vector<2xf32>
    %4 = vector.shape_cast %3 : vector<2xf32> to vector<2x1xf32>
    %cst_5 = arith.constant 3.200000e+01 : f32
    %5 = vector.broadcast %cst_5 : f32 to vector<2x1xf32>
    %6 = arith.divf %4, %5 : vector<2x1xf32>
    %7 = vector.broadcast %6 : vector<2x1xf32> to vector<2x32xf32>
    %8 = arith.subf %0, %7 : vector<2x32xf32>
    %9 = arith.mulf %8, %8 : vector<2x32xf32>
    %cst_6 = arith.constant dense<0.000000e+00> : vector<2xf32>
    %10 = vector.multi_reduction <add>, %9, %cst_6 [1] : vector<2x32xf32> to vector<2xf32>
    %11 = vector.shape_cast %10 : vector<2xf32> to vector<2x1xf32>
    %cst_7 = arith.constant 3.200000e+01 : f32
    %12 = vector.broadcast %cst_7 : f32 to vector<2x1xf32>
    %13 = arith.divf %11, %12 : vector<2x1xf32>
    %14 = vector.broadcast %6 : vector<2x1xf32> to vector<2x32xf32>
    %15 = arith.subf %0, %14 : vector<2x32xf32>
    %cst_8 = arith.constant 9.99999974E-6 : f32
    %16 = vector.broadcast %cst_8 : f32 to vector<2x1xf32>
    %17 = arith.addf %13, %16 : vector<2x1xf32>
    %18 = math.rsqrt %17 : vector<2x1xf32>
    %19 = vector.broadcast %18 : vector<2x1xf32> to vector<2x32xf32>
    %20 = arith.mulf %15, %19 : vector<2x32xf32>
    %21 = vector.broadcast %1 : vector<1x32xf32> to vector<2x32xf32>
    %22 = arith.mulf %20, %21 : vector<2x32xf32>
    %23 = vector.broadcast %2 : vector<1x32xf32> to vector<2x32xf32>
    %24 = arith.addf %22, %23 : vector<2x32xf32>
    %25 = arith.truncf %24 : vector<2x32xf32> to vector<2x32xbf16>
    %c0_9 = arith.constant 0 : index
    %c0_10 = arith.constant 0 : index
    %26 = vector.load %arg4[%c0_9, %c0_10] : memref<32x128xbf16, #tpu.memory_space<vmem>>, vector<32x128xbf16>
    %cst_11 = arith.constant dense<0.000000e+00> : vector<2x128xf32>
    %27 = tpu.matmul %25, %26, %cst_11 {dimension_numbers = #tpu.dot_dimension_numbers<[1], [0], [0], [1], [0, 0, 1, 1], [], []>} : vector<2x32xbf16>, vector<32x128xbf16>, vector<2x128xf32> -> vector<2x128xf32>
    %c0_12 = arith.constant 0 : index
    %c0_13 = arith.constant 0 : index
    %28 = vector.load %arg5[%c0_12, %c0_13] : memref<1x128xf32, #tpu.memory_space<vmem>>, vector<1x128xf32>
    %29 = vector.broadcast %28 : vector<1x128xf32> to vector<2x128xf32>
    %30 = arith.addf %27, %29 : vector<2x128xf32>
    %c0_14 = arith.constant 0 : index
    %c0_15 = arith.constant 0 : index
    %31 = vector.load %arg6[%c0_14, %c0_15] : memref<2x128xf32, #tpu.memory_space<vmem>>, vector<2x128xf32>
    tpu.vector_store %arg6[%c0_14, %c0_15], %30 {strides = array<i32>} : memref<2x128xf32, #tpu.memory_space<vmem>>, vector<2x128xf32>,
    return
  }
  func.func @transform_0(%arg0: i32) -> (i32, i32) {
    %c0_i32 = arith.constant 0 : i32
    %c0_i32_0 = arith.constant 0 : i32
    %c0_i32_1 = arith.constant 0 : i32
    return %c0_i32, %c0_i32_0 : i32, i32
  }
  func.func @transform_1(%arg0: i32) -> (i32, i32) {
    %c0_i32 = arith.constant 0 : i32
    %c0_i32_0 = arith.constant 0 : i32
    %c0_i32_1 = arith.constant 0 : i32
    return %c0_i32, %c0_i32_0 : i32, i32
  }
  func.func @transform_2(%arg0: i32) -> (i32, i32) {
    %c0_i32 = arith.constant 0 : i32
    %c0_i32_0 = arith.constant 0 : i32
    %c0_i32_1 = arith.constant 0 : i32
    return %c0_i32, %c0_i32_0 : i32, i32
  }
  func.func @transform_3(%arg0: i32) -> (i32, i32) {
    %c0_i32 = arith.constant 0 : i32
    %c0_i32_0 = arith.constant 0 : i32
    %c0_i32_1 = arith.constant 0 : i32
    return %c0_i32, %c0_i32_0 : i32, i32
  }
  func.func @transform_4(%arg0: i32) -> (i32, i32) {
    %c0_i32 = arith.constant 0 : i32
    %c0_i32_0 = arith.constant 0 : i32
    %c0_i32_1 = arith.constant 0 : i32
    return %c0_i32, %c0_i32_0 : i32, i32
  }
  func.func @transform_5(%arg0: i32) -> (i32, i32) {
    %c0_i32 = arith.constant 0 : i32
    %c0_i32_0 = arith.constant 0 : i32
    %c0_i32_1 = arith.constant 0 : i32
    return %c0_i32, %c0_i32_0 : i32, i32
  }
}

module attributes {stable_mosaic.version = 11 : i64} {
  func.func @kernel(%arg0: i32, %arg1: memref<48x48xbf16, #tpu.memory_space<vmem>>, %arg2: memref<48x32xbf16, #tpu.memory_space<vmem>>, %arg3: memref<48x32xf32, #tpu.memory_space<vmem>>, %arg4: memref<48x32xf32, #tpu.memory_space<vmem>>) attributes {dimension_semantics = [#tpu.dimension_semantics<parallel>], iteration_bounds = array<i64: 1>, scalar_prefetch = 0 : i64, scratch_operands = 0 : i64, tpu.core_type = #tpu.core_type<tc>, window_params = [{transform_indices = @transform_0, window_bounds = array<i64: 48, 48>}, {pipeline_mode = #tpu.pipeline_mode<synchronous>, transform_indices = @transform_1, window_bounds = array<i64: 48, 32>}, {transform_indices = @transform_2, window_bounds = array<i64: 48, 32>}, {transform_indices = @transform_3, window_bounds = array<i64: 48, 32>}]} {
    %c0 = arith.constant 0 : index
    %c0_0 = arith.constant 0 : index
    %0 = vector.load %arg1[%c0, %c0_0] : memref<48x48xbf16, #tpu.memory_space<vmem>>, vector<48x48xbf16>
    %c0_1 = arith.constant 0 : index
    %c0_2 = arith.constant 0 : index
    %1 = vector.load %arg2[%c0_1, %c0_2] : memref<48x32xbf16, #tpu.memory_space<vmem>>, vector<48x32xbf16>
    %cst = arith.constant dense<0.000000e+00> : vector<48x32xf32>
    %2 = tpu.matmul %0, %1, %cst {dimension_numbers = #tpu.dot_dimension_numbers<[1], [0], [0], [1], [0, 0, 1, 1], [], []>} : vector<48x48xbf16>, vector<48x32xbf16>, vector<48x32xf32> -> vector<48x32xf32>
    %c0_3 = arith.constant 0 : index
    %c0_4 = arith.constant 0 : index
    %3 = vector.load %arg3[%c0_3, %c0_4] : memref<48x32xf32, #tpu.memory_space<vmem>>, vector<48x32xf32>
    %4 = arith.addf %2, %3 : vector<48x32xf32>
    %c0_5 = arith.constant 0 : index
    %c0_6 = arith.constant 0 : index
    %5 = vector.load %arg4[%c0_5, %c0_6] : memref<48x32xf32, #tpu.memory_space<vmem>>, vector<48x32xf32>
    tpu.vector_store %arg4[%c0_5, %c0_6], %4 {strides = array<i32>} : memref<48x32xf32, #tpu.memory_space<vmem>>, vector<48x32xf32>,
    return
  }
  func.func @transform_0(%arg0: i32) -> (i32, i32) {
    %c0_i32 = arith.constant 0 : i32
    %c0_i32_0 = arith.constant 0 : i32
    return %arg0, %c0_i32 : i32, i32
  }
  func.func @transform_1(%arg0: i32) -> (i32, i32) {
    %c0_i32 = arith.constant 0 : i32
    %c0_i32_0 = arith.constant 0 : i32
    %c0_i32_1 = arith.constant 0 : i32
    return %c0_i32, %c0_i32_0 : i32, i32
  }
  func.func @transform_2(%arg0: i32) -> (i32, i32) {
    %c0_i32 = arith.constant 0 : i32
    %c0_i32_0 = arith.constant 0 : i32
    return %arg0, %c0_i32 : i32, i32
  }
  func.func @transform_3(%arg0: i32) -> (i32, i32) {
    %c0_i32 = arith.constant 0 : i32
    %c0_i32_0 = arith.constant 0 : i32
    return %arg0, %c0_i32 : i32, i32
  }
}

module attributes {stable_mosaic.version = 11 : i64} {
  func.func @kernel(%arg0: i32, %arg1: memref<48x32xf32, #tpu.memory_space<vmem>>, %arg2: memref<1x32xf32, #tpu.memory_space<vmem>>, %arg3: memref<1x32xf32, #tpu.memory_space<vmem>>, %arg4: memref<1x32xf32, #tpu.memory_space<vmem>>, %arg5: memref<1x32xf32, #tpu.memory_space<vmem>>, %arg6: memref<32x32xbf16, #tpu.memory_space<vmem>>, %arg7: memref<1x32xf32, #tpu.memory_space<vmem>>, %arg8: memref<32x32xbf16, #tpu.memory_space<vmem>>, %arg9: memref<32x32xbf16, #tpu.memory_space<vmem>>, %arg10: memref<32x32xbf16, #tpu.memory_space<vmem>>, %arg11: memref<32x32xbf16, #tpu.memory_space<vmem>>, %arg12: memref<1x32xf32, #tpu.memory_space<vmem>>, %arg13: memref<32x128xbf16, #tpu.memory_space<vmem>>, %arg14: memref<1x128xf32, #tpu.memory_space<vmem>>, %arg15: memref<128x32xbf16, #tpu.memory_space<vmem>>, %arg16: memref<1x32xf32, #tpu.memory_space<vmem>>, %arg17: memref<48x32xf32, #tpu.memory_space<vmem>>) attributes {dimension_semantics = [#tpu.dimension_semantics<parallel>], iteration_bounds = array<i64: 1>, scalar_prefetch = 0 : i64, scratch_operands = 0 : i64, tpu.core_type = #tpu.core_type<tc>, window_params = [{transform_indices = @transform_0, window_bounds = array<i64: 48, 32>}, {pipeline_mode = #tpu.pipeline_mode<synchronous>, transform_indices = @transform_1, window_bounds = array<i64: 1, 32>}, {pipeline_mode = #tpu.pipeline_mode<synchronous>, transform_indices = @transform_2, window_bounds = array<i64: 1, 32>}, {pipeline_mode = #tpu.pipeline_mode<synchronous>, transform_indices = @transform_3, window_bounds = array<i64: 1, 32>}, {pipeline_mode = #tpu.pipeline_mode<synchronous>, transform_indices = @transform_4, window_bounds = array<i64: 1, 32>}, {pipeline_mode = #tpu.pipeline_mode<synchronous>, transform_indices = @transform_5, window_bounds = array<i64: 32, 32>}, {pipeline_mode = #tpu.pipeline_mode<synchronous>, transform_indices = @transform_6, window_bounds = array<i64: 1, 32>}, {pipeline_mode = #tpu.pipeline_mode<synchronous>, transform_indices = @transform_7, window_bounds = array<i64: 32, 32>}, {pipeline_mode = #tpu.pipeline_mode<synchronous>, transform_indices = @transform_8, window_bounds = array<i64: 32, 32>}, {pipeline_mode = #tpu.pipeline_mode<synchronous>, transform_indices = @transform_9, window_bounds = array<i64: 32, 32>}, {pipeline_mode = #tpu.pipeline_mode<synchronous>, transform_indices = @transform_10, window_bounds = array<i64: 32, 32>}, {pipeline_mode = #tpu.pipeline_mode<synchronous>, transform_indices = @transform_11, window_bounds = array<i64: 1, 32>}, {pipeline_mode = #tpu.pipeline_mode<synchronous>, transform_indices = @transform_12, window_bounds = array<i64: 32, 128>}, {pipeline_mode = #tpu.pipeline_mode<synchronous>, transform_indices = @transform_13, window_bounds = array<i64: 1, 128>}, {pipeline_mode = #tpu.pipeline_mode<synchronous>, transform_indices = @transform_14, window_bounds = array<i64: 128, 32>}, {pipeline_mode = #tpu.pipeline_mode<synchronous>, transform_indices = @transform_15, window_bounds = array<i64: 1, 32>}, {transform_indices = @transform_16, window_bounds = array<i64: 48, 32>}]} {
    %c0 = arith.constant 0 : index
    %c0_0 = arith.constant 0 : index
    %0 = vector.load %arg1[%c0, %c0_0] : memref<48x32xf32, #tpu.memory_space<vmem>>, vector<48x32xf32>
    %c0_1 = arith.constant 0 : index
    %c0_2 = arith.constant 0 : index
    %1 = vector.load %arg2[%c0_1, %c0_2] : memref<1x32xf32, #tpu.memory_space<vmem>>, vector<1x32xf32>
    %c0_3 = arith.constant 0 : index
    %c0_4 = arith.constant 0 : index
    %2 = vector.load %arg3[%c0_3, %c0_4] : memref<1x32xf32, #tpu.memory_space<vmem>>, vector<1x32xf32>
    %cst = arith.constant dense<0.000000e+00> : vector<48xf32>
    %3 = vector.multi_reduction <add>, %0, %cst [1] : vector<48x32xf32> to vector<48xf32>
    %4 = vector.shape_cast %3 : vector<48xf32> to vector<48x1xf32>
    %cst_5 = arith.constant 3.200000e+01 : f32
    %5 = vector.broadcast %cst_5 : f32 to vector<48x1xf32>
    %6 = arith.divf %4, %5 : vector<48x1xf32>
    %7 = vector.broadcast %6 : vector<48x1xf32> to vector<48x32xf32>
    %8 = arith.subf %0, %7 : vector<48x32xf32>
    %9 = arith.mulf %8, %8 : vector<48x32xf32>
    %cst_6 = arith.constant dense<0.000000e+00> : vector<48xf32>
    %10 = vector.multi_reduction <add>, %9, %cst_6 [1] : vector<48x32xf32> to vector<48xf32>
    %11 = vector.shape_cast %10 : vector<48xf32> to vector<48x1xf32>
    %cst_7 = arith.constant 3.200000e+01 : f32
    %12 = vector.broadcast %cst_7 : f32 to vector<48x1xf32>
    %13 = arith.divf %11, %12 : vector<48x1xf32>
    %14 = vector.broadcast %6 : vector<48x1xf32> to vector<48x32xf32>
    %15 = arith.subf %0, %14 : vector<48x32xf32>
    %cst_8 = arith.constant 9.99999974E-6 : f32
    %16 = vector.broadcast %cst_8 : f32 to vector<48x1xf32>
    %17 = arith.addf %13, %16 : vector<48x1xf32>
    %18 = math.rsqrt %17 : vector<48x1xf32>
    %19 = vector.broadcast %18 : vector<48x1xf32> to vector<48x32xf32>
    %20 = arith.mulf %15, %19 : vector<48x32xf32>
    %21 = vector.broadcast %1 : vector<1x32xf32> to vector<48x32xf32>
    %22 = arith.mulf %20, %21 : vector<48x32xf32>
    %23 = vector.broadcast %2 : vector<1x32xf32> to vector<48x32xf32>
    %24 = arith.addf %22, %23 : vector<48x32xf32>
    %25 = arith.truncf %24 : vector<48x32xf32> to vector<48x32xbf16>
    %c0_9 = arith.constant 0 : index
    %c0_10 = arith.constant 0 : index
    %26 = vector.load %arg6[%c0_9, %c0_10] : memref<32x32xbf16, #tpu.memory_space<vmem>>, vector<32x32xbf16>
    %cst_11 = arith.constant dense<0.000000e+00> : vector<48x32xf32>
    %27 = tpu.matmul %25, %26, %cst_11 {dimension_numbers = #tpu.dot_dimension_numbers<[1], [0], [0], [1], [0, 0, 1, 1], [], []>} : vector<48x32xbf16>, vector<32x32xbf16>, vector<48x32xf32> -> vector<48x32xf32>
    %c0_12 = arith.constant 0 : index
    %c0_13 = arith.constant 0 : index
    %28 = vector.load %arg7[%c0_12, %c0_13] : memref<1x32xf32, #tpu.memory_space<vmem>>, vector<1x32xf32>
    %29 = vector.broadcast %28 : vector<1x32xf32> to vector<48x32xf32>
    %30 = arith.addf %27, %29 : vector<48x32xf32>
    %31 = arith.truncf %30 : vector<48x32xf32> to vector<48x32xbf16>
    %c0_14 = arith.constant 0 : index
    %c0_15 = arith.constant 0 : index
    %32 = vector.load %arg8[%c0_14, %c0_15] : memref<32x32xbf16, #tpu.memory_space<vmem>>, vector<32x32xbf16>
    %cst_16 = arith.constant dense<0.000000e+00> : vector<48x32xf32>
    %33 = tpu.matmul %31, %32, %cst_16 {dimension_numbers = #tpu.dot_dimension_numbers<[1], [0], [0], [1], [0, 0, 1, 1], [], []>} : vector<48x32xbf16>, vector<32x32xbf16>, vector<48x32xf32> -> vector<48x32xf32>
    %cst_17 = arith.constant dense<0xFF800000> : vector<48xf32>
    %34 = vector.multi_reduction <maximumf>, %33, %cst_17 [1] : vector<48x32xf32> to vector<48xf32>
    %35 = vector.shape_cast %34 : vector<48xf32> to vector<48x1xf32>
    %36 = vector.broadcast %35 : vector<48x1xf32> to vector<48x32xf32>
    %37 = arith.subf %33, %36 : vector<48x32xf32>
    %38 = math.exp %37 : vector<48x32xf32>
    %39 = arith.truncf %38 : vector<48x32xf32> to vector<48x32xbf16>
    %c0_18 = arith.constant 0 : index
    %c0_19 = arith.constant 0 : index
    %40 = vector.load %arg9[%c0_18, %c0_19] : memref<32x32xbf16, #tpu.memory_space<vmem>>, vector<32x32xbf16>
    %cst_20 = arith.constant dense<0.000000e+00> : vector<48x32xf32>
    %41 = tpu.matmul %39, %40, %cst_20 {dimension_numbers = #tpu.dot_dimension_numbers<[1], [0], [0], [1], [0, 0, 1, 1], [], []>} : vector<48x32xbf16>, vector<32x32xbf16>, vector<48x32xf32> -> vector<48x32xf32>
    %cst_21 = arith.constant 9.99999968E-21 : f32
    %42 = vector.broadcast %cst_21 : f32 to vector<48x32xf32>
    %43 = arith.addf %41, %42 : vector<48x32xf32>
    %44 = tpu.reciprocal %43 {approx = true} : vector<48x32xf32> -> vector<48x32xf32>
    %45 = arith.mulf %38, %44 : vector<48x32xf32>
    %46 = arith.truncf %45 : vector<48x32xf32> to vector<48x32xbf16>
    %c0_22 = arith.constant 0 : index
    %c0_23 = arith.constant 0 : index
    %47 = vector.load %arg10[%c0_22, %c0_23] : memref<32x32xbf16, #tpu.memory_space<vmem>>, vector<32x32xbf16>
    %cst_24 = arith.constant dense<0.000000e+00> : vector<48x32xf32>
    %48 = tpu.matmul %46, %47, %cst_24 {dimension_numbers = #tpu.dot_dimension_numbers<[1], [0], [0], [1], [0, 0, 1, 1], [], []>} : vector<48x32xbf16>, vector<32x32xbf16>, vector<48x32xf32> -> vector<48x32xf32>
    %49 = arith.truncf %48 : vector<48x32xf32> to vector<48x32xbf16>
    %c0_25 = arith.constant 0 : index
    %c0_26 = arith.constant 0 : index
    %50 = vector.load %arg11[%c0_25, %c0_26] : memref<32x32xbf16, #tpu.memory_space<vmem>>, vector<32x32xbf16>
    %cst_27 = arith.constant dense<0.000000e+00> : vector<48x32xf32>
    %51 = tpu.matmul %49, %50, %cst_27 {dimension_numbers = #tpu.dot_dimension_numbers<[1], [0], [0], [1], [0, 0, 1, 1], [], []>} : vector<48x32xbf16>, vector<32x32xbf16>, vector<48x32xf32> -> vector<48x32xf32>
    %c0_28 = arith.constant 0 : index
    %c0_29 = arith.constant 0 : index
    %52 = vector.load %arg12[%c0_28, %c0_29] : memref<1x32xf32, #tpu.memory_space<vmem>>, vector<1x32xf32>
    %53 = vector.broadcast %52 : vector<1x32xf32> to vector<48x32xf32>
    %54 = arith.addf %51, %53 : vector<48x32xf32>
    %55 = arith.addf %0, %54 : vector<48x32xf32>
    %c0_30 = arith.constant 0 : index
    %c0_31 = arith.constant 0 : index
    %56 = vector.load %arg4[%c0_30, %c0_31] : memref<1x32xf32, #tpu.memory_space<vmem>>, vector<1x32xf32>
    %c0_32 = arith.constant 0 : index
    %c0_33 = arith.constant 0 : index
    %57 = vector.load %arg5[%c0_32, %c0_33] : memref<1x32xf32, #tpu.memory_space<vmem>>, vector<1x32xf32>
    %cst_34 = arith.constant dense<0.000000e+00> : vector<48xf32>
    %58 = vector.multi_reduction <add>, %55, %cst_34 [1] : vector<48x32xf32> to vector<48xf32>
    %59 = vector.shape_cast %58 : vector<48xf32> to vector<48x1xf32>
    %cst_35 = arith.constant 3.200000e+01 : f32
    %60 = vector.broadcast %cst_35 : f32 to vector<48x1xf32>
    %61 = arith.divf %59, %60 : vector<48x1xf32>
    %62 = vector.broadcast %61 : vector<48x1xf32> to vector<48x32xf32>
    %63 = arith.subf %55, %62 : vector<48x32xf32>
    %64 = arith.mulf %63, %63 : vector<48x32xf32>
    %cst_36 = arith.constant dense<0.000000e+00> : vector<48xf32>
    %65 = vector.multi_reduction <add>, %64, %cst_36 [1] : vector<48x32xf32> to vector<48xf32>
    %66 = vector.shape_cast %65 : vector<48xf32> to vector<48x1xf32>
    %cst_37 = arith.constant 3.200000e+01 : f32
    %67 = vector.broadcast %cst_37 : f32 to vector<48x1xf32>
    %68 = arith.divf %66, %67 : vector<48x1xf32>
    %69 = vector.broadcast %61 : vector<48x1xf32> to vector<48x32xf32>
    %70 = arith.subf %55, %69 : vector<48x32xf32>
    %cst_38 = arith.constant 9.99999974E-6 : f32
    %71 = vector.broadcast %cst_38 : f32 to vector<48x1xf32>
    %72 = arith.addf %68, %71 : vector<48x1xf32>
    %73 = math.rsqrt %72 : vector<48x1xf32>
    %74 = vector.broadcast %73 : vector<48x1xf32> to vector<48x32xf32>
    %75 = arith.mulf %70, %74 : vector<48x32xf32>
    %76 = vector.broadcast %56 : vector<1x32xf32> to vector<48x32xf32>
    %77 = arith.mulf %75, %76 : vector<48x32xf32>
    %78 = vector.broadcast %57 : vector<1x32xf32> to vector<48x32xf32>
    %79 = arith.addf %77, %78 : vector<48x32xf32>
    %80 = arith.truncf %79 : vector<48x32xf32> to vector<48x32xbf16>
    %c0_39 = arith.constant 0 : index
    %c0_40 = arith.constant 0 : index
    %81 = vector.load %arg13[%c0_39, %c0_40] : memref<32x128xbf16, #tpu.memory_space<vmem>>, vector<32x128xbf16>
    %cst_41 = arith.constant dense<0.000000e+00> : vector<48x128xf32>
    %82 = tpu.matmul %80, %81, %cst_41 {dimension_numbers = #tpu.dot_dimension_numbers<[1], [0], [0], [1], [0, 0, 1, 1], [], []>} : vector<48x32xbf16>, vector<32x128xbf16>, vector<48x128xf32> -> vector<48x128xf32>
    %c0_42 = arith.constant 0 : index
    %c0_43 = arith.constant 0 : index
    %83 = vector.load %arg14[%c0_42, %c0_43] : memref<1x128xf32, #tpu.memory_space<vmem>>, vector<1x128xf32>
    %84 = vector.broadcast %83 : vector<1x128xf32> to vector<48x128xf32>
    %85 = arith.addf %82, %84 : vector<48x128xf32>
    %86 = arith.mulf %85, %85 : vector<48x128xf32>
    %87 = arith.mulf %85, %86 : vector<48x128xf32>
    %cst_44 = arith.constant 4.471500e-02 : f32
    %88 = vector.broadcast %cst_44 : f32 to vector<48x128xf32>
    %89 = arith.mulf %88, %87 : vector<48x128xf32>
    %90 = arith.addf %85, %89 : vector<48x128xf32>
    %cst_45 = arith.constant 0.797884583 : f32
    %91 = vector.broadcast %cst_45 : f32 to vector<48x128xf32>
    %92 = arith.mulf %91, %90 : vector<48x128xf32>
    %93 = math.tanh %92 : vector<48x128xf32>
    %cst_46 = arith.constant 1.000000e+00 : f32
    %94 = vector.broadcast %cst_46 : f32 to vector<48x128xf32>
    %95 = arith.addf %94, %93 : vector<48x128xf32>
    %cst_47 = arith.constant 5.000000e-01 : f32
    %96 = vector.broadcast %cst_47 : f32 to vector<48x128xf32>
    %97 = arith.mulf %96, %95 : vector<48x128xf32>
    %98 = arith.mulf %85, %97 : vector<48x128xf32>
    %99 = arith.truncf %98 : vector<48x128xf32> to vector<48x128xbf16>
    %c0_48 = arith.constant 0 : index
    %c0_49 = arith.constant 0 : index
    %100 = vector.load %arg15[%c0_48, %c0_49] : memref<128x32xbf16, #tpu.memory_space<vmem>>, vector<128x32xbf16>
    %cst_50 = arith.constant dense<0.000000e+00> : vector<48x32xf32>
    %101 = tpu.matmul %99, %100, %cst_50 {dimension_numbers = #tpu.dot_dimension_numbers<[1], [0], [0], [1], [0, 0, 1, 1], [], []>} : vector<48x128xbf16>, vector<128x32xbf16>, vector<48x32xf32> -> vector<48x32xf32>
    %c0_51 = arith.constant 0 : index
    %c0_52 = arith.constant 0 : index
    %102 = vector.load %arg16[%c0_51, %c0_52] : memref<1x32xf32, #tpu.memory_space<vmem>>, vector<1x32xf32>
    %103 = vector.broadcast %102 : vector<1x32xf32> to vector<48x32xf32>
    %104 = arith.addf %101, %103 : vector<48x32xf32>
    %105 = arith.addf %104, %55 : vector<48x32xf32>
    %c0_53 = arith.constant 0 : index
    %c0_54 = arith.constant 0 : index
    %106 = vector.load %arg17[%c0_53, %c0_54] : memref<48x32xf32, #tpu.memory_space<vmem>>, vector<48x32xf32>
    tpu.vector_store %arg17[%c0_53, %c0_54], %105 {strides = array<i32>} : memref<48x32xf32, #tpu.memory_space<vmem>>, vector<48x32xf32>,
    return
  }
  func.func @transform_0(%arg0: i32) -> (i32, i32) {
    %c0_i32 = arith.constant 0 : i32
    %c0_i32_0 = arith.constant 0 : i32
    return %arg0, %c0_i32 : i32, i32
  }
  func.func @transform_1(%arg0: i32) -> (i32, i32) {
    %c0_i32 = arith.constant 0 : i32
    %c0_i32_0 = arith.constant 0 : i32
    %c0_i32_1 = arith.constant 0 : i32
    return %c0_i32, %c0_i32_0 : i32, i32
  }
  func.func @transform_2(%arg0: i32) -> (i32, i32) {
    %c0_i32 = arith.constant 0 : i32
    %c0_i32_0 = arith.constant 0 : i32
    %c0_i32_1 = arith.constant 0 : i32
    return %c0_i32, %c0_i32_0 : i32, i32
  }
  func.func @transform_3(%arg0: i32) -> (i32, i32) {
    %c0_i32 = arith.constant 0 : i32
    %c0_i32_0 = arith.constant 0 : i32
    %c0_i32_1 = arith.constant 0 : i32
    return %c0_i32, %c0_i32_0 : i32, i32
  }
  func.func @transform_4(%arg0: i32) -> (i32, i32) {
    %c0_i32 = arith.constant 0 : i32
    %c0_i32_0 = arith.constant 0 : i32
    %c0_i32_1 = arith.constant 0 : i32
    return %c0_i32, %c0_i32_0 : i32, i32
  }
  func.func @transform_5(%arg0: i32) -> (i32, i32) {
    %c0_i32 = arith.constant 0 : i32
    %c0_i32_0 = arith.constant 0 : i32
    %c0_i32_1 = arith.constant 0 : i32
    return %c0_i32, %c0_i32_0 : i32, i32
  }
  func.func @transform_6(%arg0: i32) -> (i32, i32) {
    %c0_i32 = arith.constant 0 : i32
    %c0_i32_0 = arith.constant 0 : i32
    %c0_i32_1 = arith.constant 0 : i32
    return %c0_i32, %c0_i32_0 : i32, i32
  }
  func.func @transform_7(%arg0: i32) -> (i32, i32) {
    %c0_i32 = arith.constant 0 : i32
    %c0_i32_0 = arith.constant 0 : i32
    %c0_i32_1 = arith.constant 0 : i32
    return %c0_i32, %c0_i32_0 : i32, i32
  }
  func.func @transform_8(%arg0: i32) -> (i32, i32) {
    %c0_i32 = arith.constant 0 : i32
    %c0_i32_0 = arith.constant 0 : i32
    %c0_i32_1 = arith.constant 0 : i32
    return %c0_i32, %c0_i32_0 : i32, i32
  }
  func.func @transform_9(%arg0: i32) -> (i32, i32) {
    %c0_i32 = arith.constant 0 : i32
    %c0_i32_0 = arith.constant 0 : i32
    %c0_i32_1 = arith.constant 0 : i32
    return %c0_i32, %c0_i32_0 : i32, i32
  }
  func.func @transform_10(%arg0: i32) -> (i32, i32) {
    %c0_i32 = arith.constant 0 : i32
    %c0_i32_0 = arith.constant 0 : i32
    %c0_i32_1 = arith.constant 0 : i32
    return %c0_i32, %c0_i32_0 : i32, i32
  }
  func.func @transform_11(%arg0: i32) -> (i32, i32) {
    %c0_i32 = arith.constant 0 : i32
    %c0_i32_0 = arith.constant 0 : i32
    %c0_i32_1 = arith.constant 0 : i32
    return %c0_i32, %c0_i32_0 : i32, i32
  }
  func.func @transform_12(%arg0: i32) -> (i32, i32) {
    %c0_i32 = arith.constant 0 : i32
    %c0_i32_0 = arith.constant 0 : i32
    %c0_i32_1 = arith.constant 0 : i32
    return %c0_i32, %c0_i32_0 : i32, i32
  }
  func.func @transform_13(%arg0: i32) -> (i32, i32) {
    %c0_i32 = arith.constant 0 : i32
    %c0_i32_0 = arith.constant 0 : i32
    %c0_i32_1 = arith.constant 0 : i32
    return %c0_i32, %c0_i32_0 : i32, i32
  }
  func.func @transform_14(%arg0: i32) -> (i32, i32) {
    %c0_i32 = arith.constant 0 : i32
    %c0_i32_0 = arith.constant 0 : i32
    %c0_i32_1 = arith.constant 0 : i32
    return %c0_i32, %c0_i32_0 : i32, i32
  }
  func.func @transform_15(%arg0: i32) -> (i32, i32) {
    %c0_i32 = arith.constant 0 : i32
    %c0_i32_0 = arith.constant 0 : i32
    %c0_i32_1 = arith.constant 0 : i32
    return %c0_i32, %c0_i32_0 : i32, i32
  }
  func.func @transform_16(%arg0: i32) -> (i32, i32) {
    %c0_i32 = arith.constant 0 : i32
    %c0_i32_0 = arith.constant 0 : i32
    return %arg0, %c0_i32 : i32, i32
  }
}

</mosaic_0001>

<bundles_post_ra>
// kernel: _lambda_.4
= control target key start
LH: loop header
LB: loop body
LE: loop exit
PB: predicated region body
PF: predicated region fallthrough
CT: control target
= control target key end

     0   :  { %v191_v0 = vmov 0.0   ;;  %vm192_vm0 = vmmov 0   ;;  %vm66_vm1 = vcmask 392192   ;;  %vm133_vm2 = vcmask 261120   ;;  %s276_s1 = inlined_call_operand.vmem [shape: bf16[48,32], index: 1, kind: input, shape index: {}]   ;;  %s277_s0 = inlined_call_operand.vmem [shape: bf16[48,48], index: 0, kind: input, shape index: {}]   ;;  %s278_s2 = inlined_call_operand.vmem [shape: f32[48,32], index: 2, kind: input, shape index: {}]   ;;  %s279_s3 = inlined_call_operand.vmem [shape: f32[48,32], index: 3, kind: output, shape index: {}]  }
   0x1   :  { %177 = vmatprep.subr.bf16.mxu1 %v191_v0  ;;  %v185_v1 = vld [vmem:[%s276_s1] sm:$0xff]   ;;  %159 = vmatprep.subr.bf16.mxu0 %v191_v0  ;;  %v186_v2 = vld [vmem:[%s276_s1 + $0x8] sm:$0xff]   ;;  %v187_v3 = vld [vmem:[%s276_s1 + $0x10] sm:$0xff]  }
   0x2   :  { %169 = vmatprep.mubr.msk.bf16.mxu1 %vm192_vm0, %v191_v0  ;;  %165 = vmatprep.mubr.msk.bf16.mxu0 %vm192_vm0, %v191_v0  ;;  %v188_v4 = vld [vmem:[%s277_s0 + $0x8] sm:$0xff]   ;;  %v189_v5 = vld [vmem:[%s277_s0] sm:$0xff]   ;;  %v190_v6 = vld [vmem:[%s277_s0 + $0x10] sm:$0xff]  }
   0x3   :  { %180 = vmatpush3.bf16.msra.mxu1 %v185_v1  ;;  %160 = vmatpush3.bf16.msra.mxu0 %v185_v1  ;;  %v29_v7 = vld [vmem:[%s278_s2 + $0x10] sm:$0xff]  ;;  %v27_v8 = vld [vmem:[%s278_s2] sm:$0xff]  ;;  %v30_v10 = vld [vmem:[%s278_s2 + $0x18] sm:$0xff] }
   0x4   :  { %178 = vmatprep.subr.bf16.mxu1 %v191_v0  ;;  %161 = vmatprep.subr.bf16.mxu0 %v191_v0  ;;  %v28_v12 = vld [vmem:[%s278_s2 + $0x8] sm:$0xff]  ;;  %v31_v23 = vld [vmem:[%s278_s2 + $0x20] sm:$0xff] }
   0x5   :  { %v32_v25 = vld [vmem:[%s278_s2 + $0x28] sm:$0xff] }
   0x7   :  { %181 = vmatpush3.bf16.msra.mxu1 %v186_v2  ;;  %162 = vmatpush3.bf16.msra.mxu0 %v186_v2 }
   0x8   :  { %179 = vmatprep.subr.bf16.mxu1 %v191_v0  ;;  %163 = vmatprep.subr.bf16.mxu0 %v191_v0 }
   0xb   :  { %182 = vmatpush3.bf16.msra.mxu1 %v187_v3  ;;  %164 = vmatpush3.bf16.msra.mxu0 %v187_v3 }
   0xe   :  { %170 = vmatmul.mubr.msk.bf16.vlgmr.msra.gmra.mrb[0].mxu1 %vm66_vm1, %v188_v4  ;;  %166 = vmatmul.mubr.msk.bf16.vlgmr.msra.gmra.mrb[0].mxu0 %vm66_vm1, %v189_v5 }
   0xf   :  { %173 = vmatprep.mubr.msk.bf16.mxu1 %vm192_vm0, %v191_v0 }
  0x16   :  { %174 = vmatmul.mubr.msk.bf16.gmra.mrb[4].mxu1 %vm66_vm1, %v190_v6 }
  0xe1   :  { %v118_v9 = vpop.f32.mrb[0].mxu1  ;;  %v110_v11 = vpop.f32.mrb[0].mxu0 }
  0xe2   :  { %v119_v13 = vadd.f32 %v118_v9, %v29_v7  ;;  %v171_v14 = vpop.f32.mrb[1].mxu1  ;;  %v111_v15 = vadd.f32 %v110_v11, %v27_v8  ;;  %v167_v16 = vpop.f32.mrb[1].mxu0 }
  0xe3   :  { %v121_v17 = vpop.f32.mrb[2].mxu1  ;;  %v113_v18 = vpop.f32.mrb[2].mxu0 }
  0xe4   :  { %136 = vst.msk [vmem:[%s279_s3 + $0x10] sm:$0xff] %vm133_vm2, %v119_v13  ;;  %v122_v19 = vadd.f32 %v121_v17, %v30_v10  ;;  %v172_v20 = vpop.f32.mrb[3].mxu1  ;;  %134 = vst.msk [vmem:[%s279_s3] sm:$0xff] %vm133_vm2, %v111_v15  ;;  %v114_v21 = vadd.f32 %v113_v18, %v28_v12  ;;  %v168_v22 = vpop.f32.mrb[3].mxu0 }
  0xe6   :  { %137 = vst.msk [vmem:[%s279_s3 + $0x18] sm:$0xff] %vm133_vm2, %v122_v19  ;;  %135 = vst.msk [vmem:[%s279_s3 + $0x8] sm:$0xff] %vm133_vm2, %v114_v21 }
  0xe9   :  { %v126_v24 = vpop.f32.mrb[4].mxu1 }
  0xea   :  { %v127_v26 = vadd.f32 %v126_v24, %v31_v23  ;;  %v175_v27 = vpop.f32.mrb[5].mxu1 }
  0xeb   :  { %v129_v28 = vpop.f32.mrb[6].mxu1 }
  0xec   :  { %138 = vst.msk [vmem:[%s279_s3 + $0x20] sm:$0xff] %vm133_vm2, %v127_v26  ;;  %v130_v29 = vadd.f32 %v129_v28, %v32_v25  ;;  %v176_v30 = vpop.f32.mrb[7].mxu1 }
  0xee   :  { %139 = vst.msk [vmem:[%s279_s3 + $0x28] sm:$0xff] %vm133_vm2, %v130_v29 }

// kernel: _lambda_.7
= control target key start
LH: loop header
LB: loop body
LE: loop exit
PB: predicated region body
PF: predicated region fallthrough
CT: control target
= control target key end

     0   :  { %vm24_vm0 = vcmask 254976   ;;  %v149_v8 = vmov 0.0   ;;  %vm150_vm1 = vmmov 0   ;;  %vm77_vm2 = vcmask 261120   ;;  %s202_s0 = inlined_call_operand.vmem [shape: f32[2,32], index: 0, kind: input, shape index: {}]   ;;  %s203_s3 = inlined_call_operand.vmem [shape: bf16[32,128], index: 3, kind: input, shape index: {}]   ;;  %s204_s1 = inlined_call_operand.vmem [shape: f32[1,32], index: 1, kind: input, shape index: {}]   ;;  %s205_s2 = inlined_call_operand.vmem [shape: f32[1,32], index: 2, kind: input, shape index: {}]   ;;  %s206_s4 = inlined_call_operand.vmem [shape: f32[1,128], index: 4, kind: input, shape index: {}]   ;;  %s207_s5 = inlined_call_operand.vmem [shape: f32[2,128], index: 5, kind: output, shape index: {}]  }
   0x1   :  { %v21_v0 = vld [vmem:[%s202_s0] sm:$0x3]  ;;  %135 = vmatprep.subr.bf16.mxu0 %v149_v8  ;;  %v146_v9 = vld [vmem:[%s203_s3 + $0x8] sm:$0xff]   ;;  %139 = vmatprep.mubr.msk.bf16.mxu0 %vm150_vm1, %v149_v8 }
   0x2   :  { %v25_v1 = vsel %vm24_vm0, %v21_v0, 0.0  ;;  %v145_v7 = vld [vmem:[%s203_s3] sm:$0xff]  }
   0x3   :  { %26 = vadd.xlane.f32.xlu0 %v25_v1  ;;  %136 = vmatpush3.bf16.msra.mxu0 %v145_v7  ;;  %v126_v14 = vld [vmem:[%s204_s1] ss:$0 sm:$0xff] }
   0x4   :  { %137 = vmatprep.subr.bf16.mxu0 %v149_v8  ;;  %v127_v16 = vld [vmem:[%s205_s2] ss:$0 sm:$0xff] }
   0x5   :  { %v128_v20 = vld [vmem:[%s206_s4] ss:$0 sm:$0xff] }
   0x7   :  { %138 = vmatpush3.bf16.msra.mxu0 %v146_v9 }
  0x90   :  { %v27_v2 = vpop.xlane.xlu0 %26 }
  0x91   :  { %v29_v3 = vmul.f32 0.03125, %v27_v2 }
  0x93   :  { %v30_v4 = vsub.f32 %v21_v0, %v29_v3 }
  0x95   :  { %v31_v5 = vmul.f32 %v30_v4, %v30_v4 }
  0x97   :  { %v32_v6 = vsel %vm24_vm0, %v31_v5, 0.0 }
  0x98   :  { %33 = vadd.xlane.f32.xlu0 %v32_v6 }
 0x125   :  { %v34_v10 = vpop.xlane.xlu0 %33 }
 0x126   :  { %v35_v11 = vmul.f32 0.03125, %v34_v10 }
 0x128   :  { %v36_v12 = vadd.f32 1e-05, %v35_v11 }
 0x12a   :  { %147 = vrsqrt.f32 %v36_v12 }
 0x134   :  { %v148_v13 = vpop.eup %147 }
 0x135   :  { %v38_v15 = vmul.f32 %v148_v13, %v30_v4 }
 0x137   :  { %v45_v17 = vmul.f32 %v126_v14, %v38_v15 }
 0x139   :  { %v52_v18 = vadd.f32 %v127_v16, %v45_v17 }
 0x13b   :  { %v53_v19 = vpack.c.bf16 %v52_v18, %v52_v18 }
 0x13d   :  { %140 = vmatmul.mubr.msk.bf16.vlgmr.msra.gmra.mrb[0].mxu0 %vm77_vm2, %v53_v19 }
 0x210   :  { %v115_v21 = vpop.f32.mrb[0].mxu0 }
 0x211   :  { %v116_v22 = vadd.f32 %v128_v20, %v115_v21  ;;  %v141_v23 = vpop.f32.mrb[1].mxu0 }
 0x212   :  { %v118_v24 = vpop.f32.mrb[2].mxu0 }
 0x213   :  { %121 = vst [vmem:[%s207_s5] sm:$0x3] %v116_v22  ;;  %v142_v25 = vpop.f32.mrb[3].mxu0 }

// kernel: _lambda_.5
= control target key start
LH: loop header
LB: loop body
LE: loop exit
PB: predicated region body
PF: predicated region fallthrough
CT: control target
= control target key end

     0   :  { %vm62_vm0 = vcmask 261120   ;;  %v1353_v43 = vmov 0.0   ;;  %vm1354_vm1 = vmmov 0   ;;  %s1788_s0 = inlined_call_operand.vmem [shape: f32[48,32], index: 0, kind: input, shape index: {}]   ;;  %s1789_s5 = inlined_call_operand.vmem [shape: bf16[32,32], index: 5, kind: input, shape index: {}]   ;;  %s1790_s7 = inlined_call_operand.vmem [shape: bf16[32,32], index: 7, kind: input, shape index: {}]   ;;  %s1791_s1 = inlined_call_operand.vmem [shape: f32[1,32], index: 1, kind: input, shape index: {}, may-alias: {1,3}]   ;;  %s1792_s2 = inlined_call_operand.vmem [shape: f32[1,32], index: 2, kind: input, shape index: {}, may-alias: {2,4}]   ;;  %s1793_s6 = inlined_call_operand.vmem [shape: f32[1,32], index: 6, kind: input, shape index: {}]   ;;  %s1794_s8 = inlined_call_operand.vmem [shape: bf16[32,32], index: 8, kind: input, shape index: {}]   ;;  %s1795_s9 = inlined_call_operand.vmem [shape: bf16[32,32], index: 9, kind: input, shape index: {}]   ;;  %s1796_s10 = inlined_call_operand.vmem [shape: bf16[32,32], index: 10, kind: input, shape index: {}]   ;;  %s1797_s11 = inlined_call_operand.vmem [shape: f32[1,32], index: 11, kind: input, shape index: {}]   ;;  %s1798_s12 = inlined_call_operand.vmem [shape: bf16[32,128], index: 12, kind: input, shape index: {}]   ;;  %s1799_s3 = inlined_call_operand.vmem [shape: f32[1,32], index: 3, kind: input, shape index: {}, may-alias: {1,3}]   ;;  %s1800_s4 = inlined_call_operand.vmem [shape: f32[1,32], index: 4, kind: input, shape index: {}, may-alias: {2,4}]   ;;  %s1801_s14 = inlined_call_operand.vmem [shape: bf16[128,32], index: 14, kind: input, shape index: {}]   ;;  %s1802_s13 = inlined_call_operand.vmem [shape: f32[1,128], index: 13, kind: input, shape index: {}]   ;;  %s1803_s15 = inlined_call_operand.vmem [shape: f32[1,32], index: 15, kind: input, shape index: {}]   ;;  %s1804_s16 = inlined_call_operand.vmem [shape: f32[48,32], index: 16, kind: output, shape index: {}]  }
   0x1   :  { %1806 = sst [smem:[#allocation2_spill]] %s1788_s0  ;;  %v1273_v42 = vld [vmem:[%s1789_s5] sm:$0xff]   ;;  %1143 = vmatprep.subr.bf16.mxu0 %v1353_v43  ;;  %1267 = vmatprep.subr.bf16.mxu1 %v1353_v43  ;;  %v1274_v44 = vld [vmem:[%s1789_s5 + $0x8] sm:$0xff]  }
   0x2   :  { %s1807_s23 = sld [smem:[#allocation2_spill]]  ;;  %1144 = vmatpush3.bf16.msra.mxu0 %v1273_v42  ;;  %1269 = vmatpush3.bf16.msra.mxu1 %v1273_v42 }
   0x3   :  { %1145 = vmatprep.subr.bf16.mxu0 %v1353_v43  ;;  %1268 = vmatprep.subr.bf16.mxu1 %v1353_v43 }
   0x4   :  { %1147 = vmatprep.mubr.msk.bf16.mxu0 %vm1354_vm1, %v1353_v43  ;;  %1151 = vmatprep.mubr.msk.bf16.mxu1 %vm1354_vm1, %v1353_v43 }
   0x6   :  { %1146 = vmatpush3.bf16.msra.mxu0 %v1274_v44  ;;  %1270 = vmatpush3.bf16.msra.mxu1 %v1274_v44 }
   0x7   :  { %1159 = vmatprep.subr.bf16.mxu1 %v1353_v43  ;;  %1175 = vmatprep.subr.bf16.mxu0 %v1353_v43 }
   0x8   :  { %v1443_v0 = vld [vmem:[%s1807_s23] sm:$0xff]  ;;  %v1448_v1 = vld [vmem:[%s1807_s23 + $0x10] sm:$0xff]  ;;  %v1453_v2 = vld [vmem:[%s1807_s23 + $0x8] sm:$0xff] }
   0x9   :  { %v63_v3 = vsel %vm62_vm0, %v1443_v0, 0.0  ;;  %v69_v4 = vsel %vm62_vm0, %v1448_v1, 0.0  ;;  %v1462_v5 = vld [vmem:[%s1807_s23 + $0x18] sm:$0xff]  ;;  %v66_v6 = vsel %vm62_vm0, %v1453_v2, 0.0  ;;  %v1471_v8 = vld [vmem:[%s1807_s23 + $0x20] sm:$0xff]  ;;  %v1476_v9 = vld [vmem:[%s1807_s23 + $0x28] sm:$0xff] }
   0xa   :  { %64 = vadd.xlane.f32.xlu0 %v63_v3  ;;  %70 = vadd.xlane.f32.xlu1 %v69_v4  ;;  %v72_v7 = vsel %vm62_vm0, %v1462_v5, 0.0  ;;  %v75_v10 = vsel %vm62_vm0, %v1471_v8, 0.0  ;;  %v78_v11 = vsel %vm62_vm0, %v1476_v9, 0.0  ;;  %v1056_v4 = vld [vmem:[%s1791_s1] ss:$0 sm:$0xff] }
   0xe   :  { %67 = vadd.xlane.f32.xlu0 %v66_v6  ;;  %73 = vadd.xlane.f32.xlu1 %v72_v7 }
  0x12   :  { %76 = vadd.xlane.f32.xlu0 %v75_v10  ;;  %79 = vadd.xlane.f32.xlu1 %v78_v11 }
  0x97   :  { %v65_v12 = vpop.xlane.xlu0 %64  ;;  %v71_v13 = vpop.xlane.xlu1 %70 }
  0x98   :  { %v82_v14 = vmul.f32 0.03125, %v65_v12  ;;  %v84_v15 = vmul.f32 0.03125, %v71_v13  ;;  %v1057_v13 = vld [vmem:[%s1792_s2] ss:$0 sm:$0xff] }
  0x9a   :  { %v1483_v16 = vsub.f32 %v1443_v0, %v82_v14  ;;  %v1486_v17 = vsub.f32 %v1448_v1, %v84_v15 }
  0x9b   :  { %v68_v18 = vpop.xlane.xlu0 %67  ;;  %v74_v19 = vpop.xlane.xlu1 %73 }
  0x9c   :  { %v83_v20 = vmul.f32 0.03125, %v68_v18  ;;  %v85_v21 = vmul.f32 0.03125, %v74_v19  ;;  %v94_v22 = vmul.f32 %v1483_v16, %v1483_v16  ;;  %v96_v23 = vmul.f32 %v1486_v17, %v1486_v17 }
  0x9e   :  { %v1493_v24 = vsub.f32 %v1453_v2, %v83_v20  ;;  %v1496_v25 = vsub.f32 %v1462_v5, %v85_v21  ;;  %v100_v26 = vsel %vm62_vm0, %v94_v22, 0.0  ;;  %v106_v29 = vsel %vm62_vm0, %v96_v23, 0.0 }
  0x9f   :  { %101 = vadd.xlane.f32.xlu0 %v100_v26  ;;  %v77_v27 = vpop.xlane.xlu0 %76  ;;  %v80_v28 = vpop.xlane.xlu1 %79 }
  0xa0   :  { %v86_v30 = vmul.f32 0.03125, %v77_v27  ;;  %v87_v31 = vmul.f32 0.03125, %v80_v28  ;;  %v95_v32 = vmul.f32 %v1493_v24, %v1493_v24  ;;  %v97_v33 = vmul.f32 %v1496_v25, %v1496_v25 }
  0xa2   :  { %v1505_v34 = vsub.f32 %v1471_v8, %v86_v30  ;;  %v1508_v35 = vsub.f32 %v1476_v9, %v87_v31  ;;  %v103_v36 = vsel %vm62_vm0, %v95_v32, 0.0  ;;  %v109_v37 = vsel %vm62_vm0, %v97_v33, 0.0  ;;  %v1276_v32 = vld [vmem:[%s1790_s7 + $0x8] sm:$0xff]  }
  0xa3   :  { %107 = vadd.xlane.f32.xlu0 %v106_v29  ;;  %104 = vadd.xlane.f32.xlu1 %v103_v36  ;;  %v1275_v29 = vld [vmem:[%s1790_s7] sm:$0xff]  }
  0xa4   :  { %v98_v38 = vmul.f32 %v1505_v34, %v1505_v34  ;;  %v99_v39 = vmul.f32 %v1508_v35, %v1508_v35  ;;  %v1058_v36 = vld [vmem:[%s1793_s6] ss:$0 sm:$0xff] }
  0xa6   :  { %v112_v40 = vsel %vm62_vm0, %v98_v38, 0.0  ;;  %v115_v41 = vsel %vm62_vm0, %v99_v39, 0.0 }
  0xa7   :  { %110 = vadd.xlane.f32.xlu1 %v109_v37  ;;  %113 = vadd.xlane.f32.xlu0 %v112_v40 }
  0xab   :  { %116 = vadd.xlane.f32.xlu1 %v115_v41 }
 0x12c   :  { %v102_v45 = vpop.xlane.xlu0 %101 }
 0x12d   :  { %v118_v46 = vmul.f32 0.03125, %v102_v45 }
 0x12f   :  { %v124_v47 = vadd.f32 1e-05, %v118_v46 }
 0x130   :  { %v105_v48 = vpop.xlane.xlu1 %104  ;;  %v108_v49 = vpop.xlane.xlu0 %107 }
 0x131   :  { %1293 = vrsqrt.f32 %v124_v47  ;;  %v119_v50 = vmul.f32 0.03125, %v105_v48  ;;  %v120_v51 = vmul.f32 0.03125, %v108_v49 }
 0x133   :  { %v125_v52 = vadd.f32 1e-05, %v119_v50  ;;  %v126_v53 = vadd.f32 1e-05, %v120_v51 }
 0x134   :  { %v111_v54 = vpop.xlane.xlu1 %110  ;;  %v114_v55 = vpop.xlane.xlu0 %113 }
 0x135   :  { %1295 = vrsqrt.f32 %v125_v52  ;;  %v121_v56 = vmul.f32 0.03125, %v111_v54  ;;  %v122_v57 = vmul.f32 0.03125, %v114_v55 }
 0x136   :  { %1297 = vrsqrt.f32 %v126_v53 }
 0x137   :  { %v127_v58 = vadd.f32 1e-05, %v121_v56  ;;  %v128_v59 = vadd.f32 1e-05, %v122_v57 }
 0x138   :  { %v117_v60 = vpop.xlane.xlu1 %116 }
 0x139   :  { %1299 = vrsqrt.f32 %v127_v58  ;;  %v123_v61 = vmul.f32 0.03125, %v117_v60 }
 0x13a   :  { %1301 = vrsqrt.f32 %v128_v59 }
 0x13b   :  { %v1294_v62 = vpop.eup %1293  ;;  %v129_v63 = vadd.f32 1e-05, %v123_v61 }
 0x13c   :  { %v136_v3 = vmul.f32 %v1294_v62, %v1483_v16 }
 0x13d   :  { %1303 = vrsqrt.f32 %v129_v63 }
 0x13e   :  { %v148_v11 = vmul.f32 %v1056_v4, %v136_v3 }
 0x13f   :  { %v1296_v6 = vpop.eup %1295 }
 0x140   :  { %v1298_v7 = vpop.eup %1297  ;;  %v137_v10 = vmul.f32 %v1296_v6, %v1493_v24  ;;  %v160_v18 = vadd.f32 %v1057_v13, %v148_v11 }
 0x141   :  { %v138_v12 = vmul.f32 %v1298_v7, %v1486_v17 }
 0x142   :  { %v149_v14 = vmul.f32 %v1056_v4, %v137_v10 }
 0x143   :  { %v1300_v15 = vpop.eup %1299  ;;  %v150_v20 = vmul.f32 %v1056_v4, %v138_v12 }
 0x144   :  { %v139_v16 = vmul.f32 %v1300_v15, %v1496_v25  ;;  %v161_v19 = vadd.f32 %v1057_v13, %v149_v14  ;;  %v1302_v21 = vpop.eup %1301 }
 0x145   :  { %v140_v24 = vmul.f32 %v1302_v21, %v1505_v34  ;;  %v162_v17 = vadd.f32 %v1057_v13, %v150_v20  ;;  %v1277_v20 = vld [vmem:[%s1794_s8] sm:$0xff]   ;;  %v1278_v21 = vld [vmem:[%s1794_s8 + $0x8] sm:$0xff]  }
 0x146   :  { %v166_v22 = vpack.c.bf16 %v161_v19, %v160_v18  ;;  %v151_v23 = vmul.f32 %v1056_v4, %v139_v16 }
 0x147   :  { %v1304_v26 = vpop.eup %1303  ;;  %v152_v31 = vmul.f32 %v1056_v4, %v140_v24 }
 0x148   :  { %v141_v27 = vmul.f32 %v1304_v26, %v1508_v35  ;;  %1148 = vmatmul.mubr.msk.bf16.vlgmr.msra.gmra.mrb[0].mxu0 %vm62_vm0, %v166_v22  ;;  %v163_v28 = vadd.f32 %v1057_v13, %v151_v23  ;;  %v1279_v22 = vld [vmem:[%s1795_s9] sm:$0xff]  }
 0x149   :  { %1179 = vmatprep.mubr.msk.bf16.mxu0 %vm1354_vm1, %v1353_v43  ;;  %v164_v34 = vadd.f32 %v1057_v13, %v152_v31  ;;  %1176 = vmatpush3.bf16.msra.mxu0 %v1277_v20 }
 0x14a   :  { %v167_v25 = vpack.c.bf16 %v163_v28, %v162_v17  ;;  %v153_v30 = vmul.f32 %v1056_v4, %v141_v27  ;;  %1177 = vmatprep.subr.bf16.mxu0 %v1353_v43 }
 0x14c   :  { %1152 = vmatmul.mubr.msk.bf16.vlgmr.msra.gmra.mrb[0].mxu1 %vm62_vm0, %v167_v25  ;;  %v165_v33 = vadd.f32 %v1057_v13, %v153_v30 }
 0x14d   :  { %1155 = vmatprep.mubr.msk.bf16.mxu1 %vm1354_vm1, %v1353_v43  ;;  %1160 = vmatpush3.bf16.msra.mxu1 %v1275_v29 }
 0x14e   :  { %1161 = vmatprep.subr.bf16.mxu1 %v1353_v43  ;;  %v168_v35 = vpack.c.bf16 %v165_v33, %v164_v34  ;;  %1178 = vmatpush3.bf16.msra.mxu0 %v1278_v21 }
 0x14f   :  { %1207 = vmatprep.subr.bf16.mxu0 %v1353_v43 }
 0x151   :  { %1162 = vmatpush3.bf16.msra.mxu1 %v1276_v32 }
 0x152   :  { %1191 = vmatprep.subr.bf16.mxu1 %v1353_v43 }
 0x154   :  { %1156 = vmatmul.mubr.msk.bf16.gmra.mrb[4].mxu1 %vm62_vm0, %v168_v35 }
 0x155   :  { %1163 = vmatprep.mubr.msk.bf16.mxu1 %vm1354_vm1, %v1353_v43 }
 0x21b   :  { %v235_v37 = vpop.f32.mrb[0].mxu0 }
 0x21c   :  { %v1149_v38 = vpop.f32.mrb[1].mxu0  ;;  %v236_v40 = vadd.f32 %v1058_v36, %v235_v37 }
 0x21d   :  { %v238_v39 = vpop.f32.mrb[2].mxu0 }
 0x21e   :  { %v239_v41 = vadd.f32 %v1058_v36, %v238_v39  ;;  %v1150_v42 = vpop.f32.mrb[3].mxu0 }
 0x21f   :  { %v243_v44 = vpop.f32.mrb[0].mxu1 }
 0x220   :  { %v258_v45 = vpack.c.bf16 %v239_v41, %v236_v40  ;;  %v1153_v46 = vpop.f32.mrb[1].mxu1  ;;  %v244_v48 = vadd.f32 %v1058_v36, %v243_v44 }
 0x221   :  { %v246_v47 = vpop.f32.mrb[2].mxu1 }
 0x222   :  { %v247_v49 = vadd.f32 %v1058_v36, %v246_v47  ;;  %v1154_v50 = vpop.f32.mrb[3].mxu1  ;;  %1164 = vmatmul.mubr.msk.bf16.vlgmr.msra.gmra.mrb[8].mxu1 %vm62_vm0, %v258_v45 }
 0x223   :  { %1167 = vmatprep.mubr.msk.bf16.mxu1 %vm1354_vm1, %v1353_v43  ;;  %1192 = vmatpush3.bf16.msra.mxu1 %v1279_v22  ;;  %v1280_v50 = vld [vmem:[%s1795_s9 + $0x8] sm:$0xff]  }
 0x224   :  { %v259_v51 = vpack.c.bf16 %v247_v49, %v244_v48  ;;  %1193 = vmatprep.subr.bf16.mxu1 %v1353_v43 }
 0x227   :  { %v251_v52 = vpop.f32.mrb[4].mxu1  ;;  %1194 = vmatpush3.bf16.msra.mxu1 %v1280_v50 }
 0x228   :  { %v1157_v53 = vpop.f32.mrb[5].mxu1  ;;  %v252_v55 = vadd.f32 %v1058_v36, %v251_v52  ;;  %1223 = vmatprep.subr.bf16.mxu1 %v1353_v43  ;;  %v1282_v52 = vld [vmem:[%s1796_s10 + $0x8] sm:$0xff]  }
 0x229   :  { %v254_v54 = vpop.f32.mrb[6].mxu1 }
 0x22a   :  { %v255_v56 = vadd.f32 %v1058_v36, %v254_v54  ;;  %v1158_v57 = vpop.f32.mrb[7].mxu1  ;;  %1168 = vmatmul.mubr.msk.bf16.gmra.mrb[12].mxu1 %vm62_vm0, %v259_v51  ;;  %v1281_v51 = vld [vmem:[%s1796_s10] sm:$0xff]  }
 0x22b   :  { %1171 = vmatprep.mubr.msk.bf16.mxu1 %vm1354_vm1, %v1353_v43 }
 0x22c   :  { %v260_v58 = vpack.c.bf16 %v255_v56, %v252_v55 }
 0x232   :  { %1172 = vmatmul.mubr.msk.bf16.gmra.mrb[16].mxu1 %vm62_vm0, %v260_v58 }
 0x233   :  { %1195 = vmatprep.mubr.msk.bf16.mxu1 %vm1354_vm1, %v1353_v43 }
 0x2f5   :  { %v320_v59 = vpop.f32.mrb[8].mxu1 }
 0x2f6   :  { %v1165_v60 = vpop.f32.mrb[9].mxu1  ;;  %v343_v61 = vsel %vm62_vm0, %v320_v59, -inf }
 0x2f7   :  { %344 = vmax.xlane.f32.xlu0 %v343_v61  ;;  %v323_v62 = vpop.f32.mrb[10].mxu1 }
 0x2f8   :  { %v1166_v63 = vpop.f32.mrb[11].mxu1  ;;  %v346_v3 = vsel %vm62_vm0, %v323_v62, -inf }
 0x2f9   :  { %347 = vmax.xlane.f32.xlu1 %v346_v3 }
 0x2fd   :  { %v328_v4 = vpop.f32.mrb[12].mxu1 }
 0x2fe   :  { %v1169_v6 = vpop.f32.mrb[13].mxu1  ;;  %v349_v7 = vsel %vm62_vm0, %v328_v4, -inf }
 0x2ff   :  { %350 = vmax.xlane.f32.xlu0 %v349_v7  ;;  %v331_v10 = vpop.f32.mrb[14].mxu1 }
 0x300   :  { %v1170_v11 = vpop.f32.mrb[15].mxu1  ;;  %v352_v12 = vsel %vm62_vm0, %v331_v10, -inf }
 0x301   :  { %353 = vmax.xlane.f32.xlu1 %v352_v12 }
 0x305   :  { %v336_v13 = vpop.f32.mrb[16].mxu1 }
 0x306   :  { %v1173_v14 = vpop.f32.mrb[17].mxu1  ;;  %v355_v15 = vsel %vm62_vm0, %v336_v13, -inf }
 0x307   :  { %356 = vmax.xlane.f32.xlu0 %v355_v15  ;;  %v339_v16 = vpop.f32.mrb[18].mxu1 }
 0x308   :  { %v1174_v18 = vpop.f32.mrb[19].mxu1  ;;  %v358_v19 = vsel %vm62_vm0, %v339_v16, -inf }
 0x309   :  { %359 = vmax.xlane.f32.xlu1 %v358_v19 }
 0x384   :  { %v345_v23 = vpop.xlane.xlu0 %344 }
 0x385   :  { %v361_v26 = vsub.f32 %v320_v59, %v345_v23 }
 0x386   :  { %v348_v24 = vpop.xlane.xlu1 %347 }
 0x387   :  { %v367_v27 = vmul.f32 1.442695, %v361_v26  ;;  %v362_v17 = vsub.f32 %v323_v62, %v348_v24 }
 0x389   :  { %v369_v28 = vmul.f32 1.442695, %v362_v17  ;;  %1305 = vpow2.f32 %v367_v27 }
 0x38b   :  { %1307 = vpow2.f32 %v369_v28 }
 0x38c   :  { %v351_v29 = vpop.xlane.xlu0 %350 }
 0x38d   :  { %v363_v25 = vsub.f32 %v328_v4, %v351_v29 }
 0x38e   :  { %v354_v30 = vpop.xlane.xlu1 %353 }
 0x38f   :  { %v371_v31 = vmul.f32 1.442695, %v363_v25  ;;  %v364_v32 = vsub.f32 %v331_v10, %v354_v30 }
 0x391   :  { %v373_v33 = vmul.f32 1.442695, %v364_v32  ;;  %1309 = vpow2.f32 %v371_v31 }
 0x393   :  { %1311 = vpow2.f32 %v373_v33  ;;  %v1306_v34 = vpop.eup %1305 }
 0x394   :  { %v357_v35 = vpop.xlane.xlu0 %356 }
 0x395   :  { %v1308_v36 = vpop.eup %1307  ;;  %v365_v37 = vsub.f32 %v336_v13, %v357_v35 }
 0x396   :  { %v360_v38 = vpop.xlane.xlu1 %359  ;;  %v379_v39 = vpack.c.bf16 %v1308_v36, %v1306_v34 }
 0x397   :  { %v375_v40 = vmul.f32 1.442695, %v365_v37  ;;  %v366_v41 = vsub.f32 %v339_v16, %v360_v38 }
 0x398   :  { %1180 = vmatmul.mubr.msk.bf16.vlgmr.msra.gmra.mrb[4].mxu0 %vm62_vm0, %v379_v39 }
 0x399   :  { %v377_v42 = vmul.f32 1.442695, %v366_v41  ;;  %1183 = vmatprep.mubr.msk.bf16.mxu0 %vm1354_vm1, %v1353_v43  ;;  %1313 = vpow2.f32 %v375_v40  ;;  %1208 = vmatpush3.bf16.msra.mxu0 %v1281_v51 }
 0x39a   :  { %1209 = vmatprep.subr.bf16.mxu0 %v1353_v43 }
 0x39b   :  { %1315 = vpow2.f32 %v377_v42  ;;  %v1310_v44 = vpop.eup %1309 }
 0x39d   :  { %v1312_v45 = vpop.eup %1311  ;;  %1210 = vmatpush3.bf16.msra.mxu0 %v1282_v52 }
 0x39e   :  { %v380_v46 = vpack.c.bf16 %v1312_v45, %v1310_v44  ;;  %1239 = vmatprep.subr.bf16.mxu0 %v1353_v43 }
 0x3a0   :  { %1184 = vmatmul.mubr.msk.bf16.gmra.mrb[8].mxu0 %vm62_vm0, %v380_v46 }
 0x3a1   :  { %1187 = vmatprep.mubr.msk.bf16.mxu0 %vm1354_vm1, %v1353_v43 }
 0x3a3   :  { %v1314_v47 = vpop.eup %1313 }
 0x3a5   :  { %v1316_v48 = vpop.eup %1315 }
 0x3a6   :  { %v381_v49 = vpack.c.bf16 %v1316_v48, %v1314_v47 }
 0x3a8   :  { %1188 = vmatmul.mubr.msk.bf16.gmra.mrb[12].mxu0 %vm62_vm0, %v381_v49 }
 0x3a9   :  { %1211 = vmatprep.mubr.msk.bf16.mxu0 %vm1354_vm1, %v1353_v43 }
 0x46b   :  { %v441_v53 = vpop.f32.mrb[4].mxu0 }
 0x46c   :  { %v442_v54 = vadd.f32 1e-20, %v441_v53  ;;  %v1181_v55 = vpop.f32.mrb[5].mxu0 }
 0x46d   :  { %v444_v56 = vpop.f32.mrb[6].mxu0 }
 0x46e   :  { %1317 = vrcp.f32 %v442_v54  ;;  %v445_v57 = vadd.f32 1e-20, %v444_v56  ;;  %v1182_v58 = vpop.f32.mrb[7].mxu0 }
 0x470   :  { %1319 = vrcp.f32 %v445_v57 }
 0x473   :  { %v449_v59 = vpop.f32.mrb[8].mxu0 }
 0x474   :  { %v450_v60 = vadd.f32 1e-20, %v449_v59  ;;  %v1185_v61 = vpop.f32.mrb[9].mxu0 }
 0x475   :  { %v452_v62 = vpop.f32.mrb[10].mxu0 }
 0x476   :  { %1321 = vrcp.f32 %v450_v60  ;;  %v453_v63 = vadd.f32 1e-20, %v452_v62  ;;  %v1186_v3 = vpop.f32.mrb[11].mxu0 }
 0x478   :  { %v1318_v4 = vpop.eup %1317  ;;  %1323 = vrcp.f32 %v453_v63 }
 0x479   :  { %v470_v7 = vmul.f32 %v1318_v4, %v1306_v34 }
 0x47a   :  { %v1320_v6 = vpop.eup %1319 }
 0x47b   :  { %v471_v10 = vmul.f32 %v1320_v6, %v1308_v36  ;;  %v457_v11 = vpop.f32.mrb[12].mxu0 }
 0x47c   :  { %v458_v12 = vadd.f32 1e-20, %v457_v11  ;;  %v1189_v13 = vpop.f32.mrb[13].mxu0 }
 0x47d   :  { %v476_v14 = vpack.c.bf16 %v471_v10, %v470_v7  ;;  %v460_v15 = vpop.f32.mrb[14].mxu0 }
 0x47e   :  { %1325 = vrcp.f32 %v458_v12  ;;  %v461_v16 = vadd.f32 1e-20, %v460_v15  ;;  %v1190_v18 = vpop.f32.mrb[15].mxu0 }
 0x47f   :  { %1196 = vmatmul.mubr.msk.bf16.vlgmr.msra.gmra.mrb[20].mxu1 %vm62_vm0, %v476_v14 }
 0x480   :  { %v1322_v19 = vpop.eup %1321  ;;  %1327 = vrcp.f32 %v461_v16  ;;  %1199 = vmatprep.mubr.msk.bf16.mxu1 %vm1354_vm1, %v1353_v43 }
 0x481   :  { %v472_v21 = vmul.f32 %v1322_v19, %v1310_v44  ;;  %v1079_v44 = vld [vmem:[%s1797_s11] ss:$0 sm:$0xff] }
 0x482   :  { %v1324_v20 = vpop.eup %1323 }
 0x483   :  { %v473_v22 = vmul.f32 %v1324_v20, %v1312_v45 }
 0x485   :  { %v477_v23 = vpack.c.bf16 %v473_v22, %v472_v21 }
 0x487   :  { %1200 = vmatmul.mubr.msk.bf16.gmra.mrb[24].mxu1 %vm62_vm0, %v477_v23 }
 0x488   :  { %v1326_v26 = vpop.eup %1325  ;;  %1203 = vmatprep.mubr.msk.bf16.mxu1 %vm1354_vm1, %v1353_v43 }
 0x489   :  { %v474_v27 = vmul.f32 %v1326_v26, %v1314_v47 }
 0x48a   :  { %v1328_v24 = vpop.eup %1327 }
 0x48b   :  { %v475_v17 = vmul.f32 %v1328_v24, %v1316_v48 }
 0x48d   :  { %v478_v28 = vpack.c.bf16 %v475_v17, %v474_v27 }
 0x48f   :  { %1204 = vmatmul.mubr.msk.bf16.gmra.mrb[28].mxu1 %vm62_vm0, %v478_v28 }
 0x490   :  { %1227 = vmatprep.mubr.msk.bf16.mxu1 %vm1354_vm1, %v1353_v43 }
 0x552   :  { %v538_v29 = vpop.f32.mrb[20].mxu1 }
 0x553   :  { %v1197_v25 = vpop.f32.mrb[21].mxu1 }
 0x554   :  { %v541_v30 = vpop.f32.mrb[22].mxu1 }
 0x555   :  { %v561_v31 = vpack.c.bf16 %v541_v30, %v538_v29  ;;  %v1198_v32 = vpop.f32.mrb[23].mxu1 }
 0x557   :  { %1212 = vmatmul.mubr.msk.bf16.vlgmr.msra.gmra.mrb[16].mxu0 %vm62_vm0, %v561_v31 }
 0x558   :  { %1215 = vmatprep.mubr.msk.bf16.mxu0 %vm1354_vm1, %v1353_v43 }
 0x55a   :  { %v546_v33 = vpop.f32.mrb[24].mxu1 }
 0x55b   :  { %v1201_v34 = vpop.f32.mrb[25].mxu1 }
 0x55c   :  { %v549_v35 = vpop.f32.mrb[26].mxu1 }
 0x55d   :  { %v562_v36 = vpack.c.bf16 %v549_v35, %v546_v33  ;;  %v1202_v37 = vpop.f32.mrb[27].mxu1 }
 0x55f   :  { %1216 = vmatmul.mubr.msk.bf16.gmra.mrb[20].mxu0 %vm62_vm0, %v562_v36 }
 0x560   :  { %1219 = vmatprep.mubr.msk.bf16.mxu0 %vm1354_vm1, %v1353_v43 }
 0x562   :  { %v554_v38 = vpop.f32.mrb[28].mxu1 }
 0x563   :  { %v1205_v39 = vpop.f32.mrb[29].mxu1 }
 0x564   :  { %v557_v40 = vpop.f32.mrb[30].mxu1 }
 0x565   :  { %v563_v41 = vpack.c.bf16 %v557_v40, %v554_v38  ;;  %v1206_v42 = vpop.f32.mrb[31].mxu1 }
 0x566   :  { %v1284_v42 = vld [vmem:[%s1798_s12 + $0x8] sm:$0xff]  }
 0x567   :  { %1220 = vmatmul.mubr.msk.bf16.gmra.mrb[24].mxu0 %vm62_vm0, %v563_v41  ;;  %v1283_v41 = vld [vmem:[%s1798_s12] sm:$0xff]  }
 0x568   :  { %1255 = vmatprep.mubr.msk.bf16.mxu0 %vm1354_vm1, %v1353_v43  ;;  %1224 = vmatpush3.bf16.msra.mxu1 %v1283_v41  ;;  %v1087_v41 = vld [vmem:[%s1802_s13] ss:$0 sm:$0xff] }
 0x569   :  { %1225 = vmatprep.subr.bf16.mxu1 %v1353_v43 }
 0x56c   :  { %1226 = vmatpush3.bf16.msra.mxu1 %v1284_v42 }
 0x62a   :  { %v630_v45 = vpop.f32.mrb[16].mxu0 }
 0x62b   :  { %v631_v46 = vadd.f32 %v1079_v44, %v630_v45  ;;  %v1213_v47 = vpop.f32.mrb[17].mxu0 }
 0x62c   :  { %v633_v48 = vpop.f32.mrb[18].mxu0 }
 0x62d   :  { %v1636_v49 = vadd.f32 %v631_v46, %v1443_v0  ;;  %v634_v50 = vadd.f32 %v1079_v44, %v633_v48  ;;  %v1214_v51 = vpop.f32.mrb[19].mxu0 }
 0x62f   :  { %v1639_v52 = vadd.f32 %v634_v50, %v1453_v2  ;;  %v661_v53 = vsel %vm62_vm0, %v1636_v49, 0.0 }
 0x630   :  { %662 = vadd.xlane.f32.xlu0 %v661_v53 }
 0x631   :  { %v664_v54 = vsel %vm62_vm0, %v1639_v52, 0.0 }
 0x632   :  { %665 = vadd.xlane.f32.xlu1 %v664_v54  ;;  %v638_v55 = vpop.f32.mrb[20].mxu0 }
 0x633   :  { %v639_v56 = vadd.f32 %v1079_v44, %v638_v55  ;;  %v1217_v57 = vpop.f32.mrb[21].mxu0 }
 0x634   :  { %v641_v58 = vpop.f32.mrb[22].mxu0 }
 0x635   :  { %v1646_v0 = vadd.f32 %v639_v56, %v1448_v1  ;;  %v642_v59 = vadd.f32 %v1079_v44, %v641_v58  ;;  %v1218_v60 = vpop.f32.mrb[23].mxu0 }
 0x637   :  { %v1649_v2 = vadd.f32 %v642_v59, %v1462_v5  ;;  %v667_v61 = vsel %vm62_vm0, %v1646_v0, 0.0  ;;  %v1085_v59 = vld [vmem:[%s1799_s3] ss:$0 sm:$0xff] }
 0x638   :  { %668 = vadd.xlane.f32.xlu0 %v667_v61 }
 0x639   :  { %v670_v62 = vsel %vm62_vm0, %v1649_v2, 0.0 }
 0x63a   :  { %671 = vadd.xlane.f32.xlu1 %v670_v62  ;;  %v646_v63 = vpop.f32.mrb[24].mxu0 }
 0x63b   :  { %v647_v3 = vadd.f32 %v1079_v44, %v646_v63  ;;  %v1221_v4 = vpop.f32.mrb[25].mxu0 }
 0x63c   :  { %v649_v6 = vpop.f32.mrb[26].mxu0 }
 0x63d   :  { %v1656_v1 = vadd.f32 %v647_v3, %v1471_v8  ;;  %v650_v7 = vadd.f32 %v1079_v44, %v649_v6  ;;  %v1222_v10 = vpop.f32.mrb[27].mxu0 }
 0x63f   :  { %v1659_v5 = vadd.f32 %v650_v7, %v1476_v9  ;;  %v673_v11 = vsel %vm62_vm0, %v1656_v1, 0.0  ;;  %v1086_v7 = vld [vmem:[%s1800_s4] ss:$0 sm:$0xff] }
 0x640   :  { %674 = vadd.xlane.f32.xlu0 %v673_v11 }
 0x641   :  { %v676_v12 = vsel %vm62_vm0, %v1659_v5, 0.0 }
 0x642   :  { %677 = vadd.xlane.f32.xlu1 %v676_v12 }
 0x6bd   :  { %v663_v13 = vpop.xlane.xlu0 %662 }
 0x6be   :  { %v679_v14 = vmul.f32 0.03125, %v663_v13 }
 0x6bf   :  { %v666_v15 = vpop.xlane.xlu1 %665 }
 0x6c0   :  { %v685_v16 = vsub.f32 %v1636_v49, %v679_v14  ;;  %v680_v8 = vmul.f32 0.03125, %v666_v15 }
 0x6c2   :  { %v686_v18 = vsub.f32 %v1639_v52, %v680_v8  ;;  %v691_v19 = vmul.f32 %v685_v16, %v685_v16 }
 0x6c4   :  { %v697_v9 = vsel %vm62_vm0, %v691_v19, 0.0  ;;  %v692_v20 = vmul.f32 %v686_v18, %v686_v18 }
 0x6c5   :  { %v669_v21 = vpop.xlane.xlu0 %668  ;;  %698 = vadd.xlane.f32.xlu0 %v697_v9 }
 0x6c6   :  { %v681_v22 = vmul.f32 0.03125, %v669_v21  ;;  %v700_v23 = vsel %vm62_vm0, %v692_v20, 0.0 }
 0x6c7   :  { %v672_v26 = vpop.xlane.xlu1 %671  ;;  %701 = vadd.xlane.f32.xlu1 %v700_v23 }
 0x6c8   :  { %v1670_v24 = vsub.f32 %v1646_v0, %v681_v22  ;;  %v682_v27 = vmul.f32 0.03125, %v672_v26 }
 0x6ca   :  { %v1673_v17 = vsub.f32 %v1649_v2, %v682_v27  ;;  %v693_v28 = vmul.f32 %v1670_v24, %v1670_v24 }
 0x6cc   :  { %v703_v29 = vsel %vm62_vm0, %v693_v28, 0.0  ;;  %v694_v25 = vmul.f32 %v1673_v17, %v1673_v17 }
 0x6cd   :  { %704 = vadd.xlane.f32.xlu0 %v703_v29  ;;  %v675_v30 = vpop.xlane.xlu0 %674 }
 0x6ce   :  { %v683_v31 = vmul.f32 0.03125, %v675_v30  ;;  %v706_v32 = vsel %vm62_vm0, %v694_v25, 0.0 }
 0x6cf   :  { %707 = vadd.xlane.f32.xlu1 %v706_v32  ;;  %v678_v33 = vpop.xlane.xlu1 %677 }
 0x6d0   :  { %v1682_v34 = vsub.f32 %v1656_v1, %v683_v31  ;;  %v684_v35 = vmul.f32 0.03125, %v678_v33  ;;  %v1285_v33 = vld [vmem:[%s1801_s14] sm:$0xff]  }
 0x6d1   :  { %1240 = vmatpush3.bf16.msra.mxu0 %v1285_v33 }
 0x6d2   :  { %v1685_v36 = vsub.f32 %v1659_v5, %v684_v35  ;;  %v695_v37 = vmul.f32 %v1682_v34, %v1682_v34  ;;  %1241 = vmatprep.subr.bf16.mxu0 %v1353_v43  ;;  %v1287_v35 = vld [vmem:[%s1801_s14 + $0x10] sm:$0xff]  }
 0x6d4   :  { %v709_v38 = vsel %vm62_vm0, %v695_v37, 0.0  ;;  %v696_v39 = vmul.f32 %v1685_v36, %v1685_v36  ;;  %v1289_v37 = vld [vmem:[%s1801_s14 + $0x20] sm:$0xff]  }
 0x6d5   :  { %710 = vadd.xlane.f32.xlu0 %v709_v38  ;;  %v1290_v38 = vld [vmem:[%s1801_s14 + $0x28] sm:$0xff]  }
 0x6d6   :  { %v712_v40 = vsel %vm62_vm0, %v696_v39, 0.0  ;;  %v1291_v39 = vld [vmem:[%s1801_s14 + $0x30] sm:$0xff]  }
 0x6d7   :  { %713 = vadd.xlane.f32.xlu1 %v712_v40  ;;  %v1292_v40 = vld [vmem:[%s1801_s14 + $0x38] sm:$0xff]  }
 0x752   :  { %v699_v44 = vpop.xlane.xlu0 %698 }
 0x753   :  { %v715_v45 = vmul.f32 0.03125, %v699_v44 }
 0x754   :  { %v702_v46 = vpop.xlane.xlu1 %701 }
 0x755   :  { %v721_v47 = vadd.f32 1e-05, %v715_v45  ;;  %v716_v48 = vmul.f32 0.03125, %v702_v46 }
 0x757   :  { %1329 = vrsqrt.f32 %v721_v47  ;;  %v722_v50 = vadd.f32 1e-05, %v716_v48 }
 0x759   :  { %1331 = vrsqrt.f32 %v722_v50 }
 0x75a   :  { %v705_v51 = vpop.xlane.xlu0 %704 }
 0x75b   :  { %v717_v53 = vmul.f32 0.03125, %v705_v51 }
 0x75c   :  { %v708_v54 = vpop.xlane.xlu1 %707 }
 0x75d   :  { %v723_v55 = vadd.f32 1e-05, %v717_v53  ;;  %v718_v56 = vmul.f32 0.03125, %v708_v54 }
 0x75f   :  { %1333 = vrsqrt.f32 %v723_v55  ;;  %v724_v57 = vadd.f32 1e-05, %v718_v56 }
 0x761   :  { %v1330_v58 = vpop.eup %1329  ;;  %1335 = vrsqrt.f32 %v724_v57 }
 0x762   :  { %v733_v60 = vmul.f32 %v1330_v58, %v685_v16  ;;  %v711_v61 = vpop.xlane.xlu0 %710 }
 0x763   :  { %v1332_v62 = vpop.eup %1331  ;;  %v719_v63 = vmul.f32 0.03125, %v711_v61 }
 0x764   :  { %v745_v3 = vmul.f32 %v1085_v59, %v733_v60  ;;  %v734_v4 = vmul.f32 %v1332_v62, %v686_v18  ;;  %v714_v6 = vpop.xlane.xlu1 %713 }
 0x765   :  { %v725_v10 = vadd.f32 1e-05, %v719_v63  ;;  %v720_v11 = vmul.f32 0.03125, %v714_v6 }
 0x766   :  { %v746_v12 = vmul.f32 %v1085_v59, %v734_v4  ;;  %v757_v14 = vadd.f32 %v1086_v7, %v745_v3 }
 0x767   :  { %1337 = vrsqrt.f32 %v725_v10  ;;  %v726_v13 = vadd.f32 1e-05, %v720_v11 }
 0x768   :  { %v758_v15 = vadd.f32 %v1086_v7, %v746_v12 }
 0x769   :  { %v1334_v8 = vpop.eup %1333  ;;  %1339 = vrsqrt.f32 %v726_v13 }
 0x76a   :  { %v735_v16 = vmul.f32 %v1334_v8, %v1670_v24  ;;  %v763_v19 = vpack.c.bf16 %v758_v15, %v757_v14 }
 0x76b   :  { %v1336_v9 = vpop.eup %1335 }
 0x76c   :  { %v736_v18 = vmul.f32 %v1336_v9, %v1673_v17  ;;  %1228 = vmatmul.mubr.msk.bf16.vlgmr.msra.gmra.mrb[32].mxu1 %vm62_vm0, %v763_v19  ;;  %v747_v20 = vmul.f32 %v1085_v59, %v735_v16 }
 0x76d   :  { %1231 = vmatprep.mubr.msk.bf16.mxu1 %vm1354_vm1, %v1353_v43 }
 0x76e   :  { %v748_v21 = vmul.f32 %v1085_v59, %v736_v18  ;;  %v759_v22 = vadd.f32 %v1086_v7, %v747_v20 }
 0x770   :  { %v760_v23 = vadd.f32 %v1086_v7, %v748_v21 }
 0x771   :  { %v1338_v26 = vpop.eup %1337 }
 0x772   :  { %v737_v27 = vmul.f32 %v1338_v26, %v1682_v34  ;;  %v764_v28 = vpack.c.bf16 %v760_v23, %v759_v22  ;;  %v1286_v34 = vld [vmem:[%s1801_s14 + $0x8] sm:$0xff]  }
 0x773   :  { %v1340_v29 = vpop.eup %1339  ;;  %1242 = vmatpush3.bf16.msra.mxu0 %v1286_v34 }
 0x774   :  { %v738_v24 = vmul.f32 %v1340_v29, %v1685_v36  ;;  %1232 = vmatmul.mubr.msk.bf16.gmra.mrb[36].mxu1 %vm62_vm0, %v764_v28  ;;  %v749_v25 = vmul.f32 %v1085_v59, %v737_v27  ;;  %1243 = vmatprep.subr.bf16.mxu0 %v1353_v43  ;;  %v1288_v36 = vld [vmem:[%s1801_s14 + $0x18] sm:$0xff]  }
 0x775   :  { %1235 = vmatprep.mubr.msk.bf16.mxu1 %vm1354_vm1, %v1353_v43 }
 0x776   :  { %v750_v17 = vmul.f32 %v1085_v59, %v738_v24  ;;  %v761_v30 = vadd.f32 %v1086_v7, %v749_v25 }
 0x777   :  { %1244 = vmatpush3.bf16.msra.mxu0 %v1287_v35 }
 0x778   :  { %v762_v31 = vadd.f32 %v1086_v7, %v750_v17  ;;  %1245 = vmatprep.subr.bf16.mxu0 %v1353_v43 }
 0x77a   :  { %v765_v32 = vpack.c.bf16 %v762_v31, %v761_v30 }
 0x77b   :  { %1246 = vmatpush3.bf16.msra.mxu0 %v1288_v36 }
 0x77c   :  { %1236 = vmatmul.mubr.msk.bf16.gmra.mrb[40].mxu1 %vm62_vm0, %v765_v32  ;;  %1247 = vmatprep.subr.bf16.mxu0 %v1353_v43 }
 0x77f   :  { %1248 = vmatpush3.bf16.msra.mxu0 %v1289_v37 }
 0x780   :  { %1249 = vmatprep.subr.bf16.mxu0 %v1353_v43 }
 0x783   :  { %1250 = vmatpush3.bf16.msra.mxu0 %v1290_v38 }
 0x784   :  { %1251 = vmatprep.subr.bf16.mxu0 %v1353_v43 }
 0x787   :  { %1252 = vmatpush3.bf16.msra.mxu0 %v1291_v39 }
 0x788   :  { %1253 = vmatprep.subr.bf16.mxu0 %v1353_v43 }
 0x78b   :  { %1254 = vmatpush3.bf16.msra.mxu0 %v1292_v40 }
 0x83f   :  { %v832_v42 = vpop.f32.mrb[32].mxu1 }
 0x840   :  { %v833_v44 = vadd.f32 %v1087_v41, %v832_v42  ;;  %v1229_v45 = vpop.f32.mrb[33].mxu1 }
 0x841   :  { %v835_v46 = vpop.f32.mrb[34].mxu1 }
 0x842   :  { %v855_v47 = vmul.f32 %v833_v44, %v833_v44  ;;  %v836_v48 = vadd.f32 %v1087_v41, %v835_v46  ;;  %v1230_v50 = vpop.f32.mrb[35].mxu1 }
 0x844   :  { %v861_v51 = vmul.f32 %v855_v47, %v833_v44  ;;  %v856_v53 = vmul.f32 %v836_v48, %v836_v48 }
 0x846   :  { %v867_v54 = vmul.f32 0.044715, %v861_v51  ;;  %v862_v55 = vmul.f32 %v856_v53, %v836_v48 }
 0x847   :  { %v840_v56 = vpop.f32.mrb[36].mxu1 }
 0x848   :  { %v873_v57 = vadd.f32 %v867_v54, %v833_v44  ;;  %v868_v58 = vmul.f32 0.044715, %v862_v55  ;;  %v841_v59 = vadd.f32 %v1087_v41, %v840_v56  ;;  %v1233_v60 = vpop.f32.mrb[37].mxu1 }
 0x849   :  { %v843_v61 = vpop.f32.mrb[38].mxu1 }
 0x84a   :  { %v879_v62 = vmul.f32 0.7978846, %v873_v57  ;;  %v874_v63 = vadd.f32 %v868_v58, %v836_v48  ;;  %v857_v3 = vmul.f32 %v841_v59, %v841_v59  ;;  %v844_v4 = vadd.f32 %v1087_v41, %v843_v61  ;;  %v1234_v6 = vpop.f32.mrb[39].mxu1 }
 0x84c   :  { %1341 = vtanh.f32 %v879_v62  ;;  %v880_v7 = vmul.f32 0.7978846, %v874_v63  ;;  %v863_v10 = vmul.f32 %v857_v3, %v841_v59  ;;  %v858_v11 = vmul.f32 %v844_v4, %v844_v4 }
 0x84e   :  { %1343 = vtanh.f32 %v880_v7  ;;  %v869_v12 = vmul.f32 0.044715, %v863_v10  ;;  %v864_v13 = vmul.f32 %v858_v11, %v844_v4 }
 0x84f   :  { %v848_v14 = vpop.f32.mrb[40].mxu1 }
 0x850   :  { %v875_v15 = vadd.f32 %v869_v12, %v841_v59  ;;  %v870_v8 = vmul.f32 0.044715, %v864_v13  ;;  %v849_v16 = vadd.f32 %v1087_v41, %v848_v14  ;;  %v1237_v19 = vpop.f32.mrb[41].mxu1 }
 0x851   :  { %v851_v9 = vpop.f32.mrb[42].mxu1 }
 0x852   :  { %v881_v18 = vmul.f32 0.7978846, %v875_v15  ;;  %v876_v20 = vadd.f32 %v870_v8, %v844_v4  ;;  %v859_v21 = vmul.f32 %v849_v16, %v849_v16  ;;  %v852_v22 = vadd.f32 %v1087_v41, %v851_v9  ;;  %v1238_v23 = vpop.f32.mrb[43].mxu1 }
 0x854   :  { %1345 = vtanh.f32 %v881_v18  ;;  %v882_v26 = vmul.f32 0.7978846, %v876_v20  ;;  %v865_v27 = vmul.f32 %v859_v21, %v849_v16  ;;  %v860_v28 = vmul.f32 %v852_v22, %v852_v22 }
 0x856   :  { %v1342_v29 = vpop.eup %1341  ;;  %1347 = vtanh.f32 %v882_v26  ;;  %v871_v24 = vmul.f32 0.044715, %v865_v27  ;;  %v866_v25 = vmul.f32 %v860_v28, %v852_v22 }
 0x857   :  { %v891_v17 = vadd.f32 1.0, %v1342_v29 }
 0x858   :  { %v1344_v30 = vpop.eup %1343  ;;  %v877_v31 = vadd.f32 %v871_v24, %v849_v16  ;;  %v872_v32 = vmul.f32 0.044715, %v866_v25 }
 0x859   :  { %v897_v33 = vmul.f32 0.5, %v891_v17  ;;  %v892_v34 = vadd.f32 1.0, %v1344_v30 }
 0x85a   :  { %v883_v35 = vmul.f32 0.7978846, %v877_v31  ;;  %v878_v36 = vadd.f32 %v872_v32, %v852_v22 }
 0x85b   :  { %v898_v37 = vmul.f32 0.5, %v892_v34  ;;  %v903_v39 = vmul.f32 %v897_v33, %v833_v44 }
 0x85c   :  { %1349 = vtanh.f32 %v883_v35  ;;  %v884_v38 = vmul.f32 0.7978846, %v878_v36 }
 0x85d   :  { %v904_v40 = vmul.f32 %v898_v37, %v836_v48 }
 0x85e   :  { %v1346_v41 = vpop.eup %1345  ;;  %1351 = vtanh.f32 %v884_v38 }
 0x85f   :  { %v909_v42 = vpack.c.bf16 %v904_v40, %v903_v39  ;;  %v893_v45 = vadd.f32 1.0, %v1346_v41 }
 0x860   :  { %v1348_v46 = vpop.eup %1347 }
 0x861   :  { %1256 = vmatmul.mubr.bf16.vlgmr.msra.gmra.mrb[28].mxu0 %v909_v42  ;;  %v894_v47 = vadd.f32 1.0, %v1348_v46  ;;  %v899_v50 = vmul.f32 0.5, %v893_v45 }
 0x862   :  { %1259 = vmatprep.mubr.msk.bf16.mxu0 %vm1354_vm1, %v1353_v43 }
 0x863   :  { %v900_v51 = vmul.f32 0.5, %v894_v47  ;;  %v905_v53 = vmul.f32 %v899_v50, %v841_v59  ;;  %v1093_v59 = vld [vmem:[%s1803_s15] ss:$0 sm:$0xff] }
 0x865   :  { %v906_v54 = vmul.f32 %v900_v51, %v844_v4 }
 0x866   :  { %v1350_v55 = vpop.eup %1349 }
 0x867   :  { %v910_v56 = vpack.c.bf16 %v906_v54, %v905_v53  ;;  %v895_v57 = vadd.f32 1.0, %v1350_v55 }
 0x868   :  { %v1352_v58 = vpop.eup %1351 }
 0x869   :  { %1260 = vmatmul.mubr.bf16.gmra.mrb[32].mxu0 %v910_v56  ;;  %v896_v44 = vadd.f32 1.0, %v1352_v58  ;;  %v901_v48 = vmul.f32 0.5, %v895_v57 }
 0x86a   :  { %1263 = vmatprep.mubr.msk.bf16.mxu0 %vm1354_vm1, %v1353_v43 }
 0x86b   :  { %v902_v60 = vmul.f32 0.5, %v896_v44  ;;  %v907_v61 = vmul.f32 %v901_v48, %v849_v16 }
 0x86d   :  { %v908_v62 = vmul.f32 %v902_v60, %v852_v22 }
 0x86f   :  { %v911_v63 = vpack.c.bf16 %v908_v62, %v907_v61 }
 0x871   :  { %1264 = vmatmul.mubr.bf16.gmra.mrb[36].mxu0 %v911_v63 }
 0x934   :  { %v1017_v3 = vpop.f32.mrb[28].mxu0 }
 0x935   :  { %v1018_v4 = vadd.f32 %v1093_v59, %v1017_v3  ;;  %v1257_v6 = vpop.f32.mrb[29].mxu0 }
 0x936   :  { %v1020_v7 = vpop.f32.mrb[30].mxu0 }
 0x937   :  { %v1040_v10 = vadd.f32 %v1018_v4, %v1636_v49  ;;  %v1021_v11 = vadd.f32 %v1093_v59, %v1020_v7  ;;  %v1258_v12 = vpop.f32.mrb[31].mxu0 }
 0x939   :  { %1046 = vst.msk [vmem:[%s1804_s16] sm:$0xff] %vm62_vm0, %v1040_v10  ;;  %v1041_v43 = vadd.f32 %v1021_v11, %v1639_v52 }
 0x93b   :  { %1047 = vst.msk [vmem:[%s1804_s16 + $0x8] sm:$0xff] %vm62_vm0, %v1041_v43 }
 0x93c   :  { %v1025_v13 = vpop.f32.mrb[32].mxu0 }
 0x93d   :  { %v1026_v14 = vadd.f32 %v1093_v59, %v1025_v13  ;;  %v1261_v15 = vpop.f32.mrb[33].mxu0 }
 0x93e   :  { %v1028_v8 = vpop.f32.mrb[34].mxu0 }
 0x93f   :  { %v1042_v49 = vadd.f32 %v1026_v14, %v1646_v0  ;;  %v1029_v16 = vadd.f32 %v1093_v59, %v1028_v8  ;;  %v1262_v19 = vpop.f32.mrb[35].mxu0 }
 0x941   :  { %1048 = vst.msk [vmem:[%s1804_s16 + $0x10] sm:$0xff] %vm62_vm0, %v1042_v49  ;;  %v1043_v52 = vadd.f32 %v1029_v16, %v1649_v2 }
 0x943   :  { %1049 = vst.msk [vmem:[%s1804_s16 + $0x18] sm:$0xff] %vm62_vm0, %v1043_v52 }
 0x944   :  { %v1033_v9 = vpop.f32.mrb[36].mxu0 }
 0x945   :  { %v1034_v18 = vadd.f32 %v1093_v59, %v1033_v9  ;;  %v1265_v20 = vpop.f32.mrb[37].mxu0 }
 0x946   :  { %v1036_v21 = vpop.f32.mrb[38].mxu0 }
 0x947   :  { %v1044_v0 = vadd.f32 %v1034_v18, %v1656_v1  ;;  %v1037_v22 = vadd.f32 %v1093_v59, %v1036_v21  ;;  %v1266_v23 = vpop.f32.mrb[39].mxu0 }
 0x949   :  { %1050 = vst.msk [vmem:[%s1804_s16 + $0x20] sm:$0xff] %vm62_vm0, %v1044_v0  ;;  %v1045_v2 = vadd.f32 %v1037_v22, %v1659_v5 }
 0x94b   :  { %1051 = vst.msk [vmem:[%s1804_s16 + $0x28] sm:$0xff] %vm62_vm0, %v1045_v2 }

</bundles_post_ra>
